<compile_context>
chip_gen: v7x
topology: tpu7x:2x2x1
jax: 0.10.0
libtpu: 0.0.40
codegen_flags: <defaults>
</compile_context>

<pallas_src>
import math
import numpy as np
import jax
import jax.numpy as jnp
from jax.experimental import pallas as pl
from jax.experimental.pallas import tpu as pltpu

STATE_DIM = 128
ACTION_DIM = 8
BATCH = 2            # small demo batch (padded to one TM-row tile inside the wrapper)
EPS = 1e-5           # nn.LayerNorm default eps

# Dimensions derived exactly as in AdaptiveActorCritic.__init__
HIDDEN = min(1024, max(256, STATE_DIM * 2))                      # 256
NUM_LAYERS = max(2, min(4, STATE_DIM // 64))                     # 2
SHARED_DIMS = [HIDDEN // (2 ** i) for i in range(NUM_LAYERS)]    # [256, 128]
D0 = SHARED_DIMS[0]                                              # 256
FEAT_DIM = SHARED_DIMS[-1]                                       # 128
ACTOR_DIM = max(64, HIDDEN // 4)                                 # 64
CRITIC_DIM = max(64, HIDDEN // 4)                                # 64
HEAD_W = ACTOR_DIM + CRITIC_DIM                                  # 128 (fused head width)
WPACK_W = D0 + 2 * HEAD_W                                        # 512

TM = 128             # batch-tile rows per grid step


def _layernorm(h, gamma, beta):
    mu = jnp.mean(h, axis=-1, keepdims=True)
    var = jnp.mean(jnp.square(h - mu), axis=-1, keepdims=True)
    return (h - mu) * jax.lax.rsqrt(var + EPS) * gamma + beta


def actor_critic_kernel(state_ref, wpack_ref, w2_ref, vec_ref, out_ref):
    x = state_ref[...]                                           # (TM, 128)

    # static, 128-aligned lane slices of the packed weights (no tile-crossing)
    w1 = wpack_ref[:, 0:D0]                                      # (128, 256)
    wh1 = wpack_ref[:, D0:D0 + HEAD_W]                           # (128, 128) = [wa1 | wc1]
    wh2 = wpack_ref[:, D0 + HEAD_W:D0 + 2 * HEAD_W]              # (128, 128) block-diag pack

    b1 = vec_ref[0:1, :]                                         # (1, 256)
    g1 = vec_ref[1:2, :]
    be1 = vec_ref[2:3, :]
    b2 = vec_ref[3:4, 0:FEAT_DIM]                                # (1, 128)
    g2 = vec_ref[4:5, 0:FEAT_DIM]
    be2 = vec_ref[5:6, 0:FEAT_DIM]
    bh1 = vec_ref[6:7, 0:HEAD_W]                                 # (1, 128) = [ba1 | bc1]
    bh2 = vec_ref[7:8, 0:HEAD_W]                                 # (1, 128) = [ba2 | bc2 | 0]

    # ---- shared block 0: Linear -> LayerNorm -> ReLU -> Dropout(identity, eval) ----
    h = jnp.dot(x, w1, preferred_element_type=jnp.float32) + b1
    h = jnp.maximum(_layernorm(h, g1, be1), 0.0)

    # ---- shared block 1 ----
    h = jnp.dot(h, w2_ref[...], preferred_element_type=jnp.float32) + b2
    feat = jnp.maximum(_layernorm(h, g2, be2), 0.0)              # (TM, 128)

    # ---- fused actor/critic first layers: one 128-lane matmul + ReLU ----
    hh = jnp.dot(feat, wh1, preferred_element_type=jnp.float32) + bh1
    hh = jnp.maximum(hh, 0.0)                                    # lanes 0:64 actor, 64:128 critic

    # ---- fused output layers -> lane-dense (TM, 128) slab ----
    # wh2 is block-diagonal: [0:64, 0:8] = wa2, [64:128, 8] = wc2, rest zero
    slab = jnp.dot(hh, wh2, preferred_element_type=jnp.float32) + bh2
    # lanes 0:8 = actor logits, lane 8 = value, lanes 9:128 = 0

    # masked softmax over actor lanes [0, ACTION_DIM)
    lane = jax.lax.broadcasted_iota(jnp.int32, slab.shape, dimension=1)
    actor_mask = lane < ACTION_DIM
    logits = jnp.where(actor_mask, slab, -jnp.inf)
    m = jnp.max(logits, axis=-1, keepdims=True)
    e = jnp.exp(logits - m)                                      # masked lanes -> exp(-inf) = 0
    inv = pl.reciprocal(jnp.sum(e, axis=-1, keepdims=True), approx=False)
    probs = e * inv

    # single lane-dense store: probs in lanes 0:8, value in lane 8, zeros elsewhere
    out_ref[...] = jnp.where(lane == ACTION_DIM, slab, probs)


def adaptive_actor_critic_forward(state, packed):
    """state: (B, 128) fp32 -> (probs (B, 8), value (B, 1))."""
    w_pack, w2, vec = packed
    b = state.shape[0]
    pb = ((b + TM - 1) // TM) * TM
    if pb != b:
        state = jnp.pad(state, ((0, pb - b), (0, 0)))

    slab = pl.pallas_call(
        actor_critic_kernel,
        out_shape=jax.ShapeDtypeStruct((pb, HEAD_W), jnp.float32),
        grid=(pb // TM,),
        in_specs=[
            pl.BlockSpec((TM, STATE_DIM), lambda i: (i, 0)),
            pl.BlockSpec((STATE_DIM, WPACK_W), lambda i: (0, 0)),   # VMEM-resident weights
            pl.BlockSpec((D0, FEAT_DIM), lambda i: (0, 0)),
            pl.BlockSpec((8, D0), lambda i: (0, 0)),
        ],
        out_specs=pl.BlockSpec((TM, HEAD_W), lambda i: (i, 0)),
        compiler_params=pltpu.CompilerParams(
            dimension_semantics=("parallel",)),
    )(state, w_pack, w2, vec)

    probs = slab[:b, :ACTION_DIM]
    value = slab[:b, ACTION_DIM:ACTION_DIM + 1]
    return probs, value


def init_params(key):
    """Parameter shapes match AdaptiveActorCritic(state_dim=128, action_dim=8).
    Linear weights: orthogonal(gain=sqrt(2)) as in the module. Biases / LayerNorm
    affines get small deterministic random values so the packing path is exercised
    numerically (the module zero/one-inits them; forward semantics are identical)."""
    ortho = jax.nn.initializers.orthogonal(scale=math.sqrt(2.0))
    ks = jax.random.split(key, 16)
    small = lambda k, shape: 0.05 * jax.random.normal(k, shape, jnp.float32)

    w1 = ortho(ks[0], (STATE_DIM, D0), jnp.float32)
    b1 = small(ks[1], (D0,))
    g1 = 1.0 + small(ks[2], (D0,))
    be1 = small(ks[3], (D0,))

    w2 = ortho(ks[4], (D0, FEAT_DIM), jnp.float32)
    b2 = small(ks[5], (FEAT_DIM,))
    g2 = 1.0 + small(ks[6], (FEAT_DIM,))
    be2 = small(ks[7], (FEAT_DIM,))

    wa1 = ortho(ks[8], (FEAT_DIM, ACTOR_DIM), jnp.float32)
    ba1 = small(ks[9], (ACTOR_DIM,))
    wa2 = ortho(ks[10], (ACTOR_DIM, ACTION_DIM), jnp.float32)
    ba2 = small(ks[11], (ACTION_DIM,))

    wc1 = ortho(ks[12], (FEAT_DIM, CRITIC_DIM), jnp.float32)
    bc1 = small(ks[13], (CRITIC_DIM,))
    wc2 = ortho(ks[14], (CRITIC_DIM, 1), jnp.float32)
    bc2 = small(ks[15], (1,))

    return (w1, b1, g1, be1, w2, b2, g2, be2,
            wa1, ba1, wa2, ba2, wc1, bc1, wc2, bc2)


def pack_params(raw):
    """Coalesce 16 parameter arrays into 3 kernel inputs."""
    (w1, b1, g1, be1, w2, b2, g2, be2,
     wa1, ba1, wa2, ba2, wc1, bc1, wc2, bc2) = raw

    wh1 = jnp.concatenate([wa1, wc1], axis=1)                     # (128, 128)
    wh2 = jnp.zeros((HEAD_W, HEAD_W), jnp.float32)
    wh2 = wh2.at[:ACTOR_DIM, :ACTION_DIM].set(wa2)                # actor output weights
    wh2 = wh2.at[ACTOR_DIM:, ACTION_DIM].set(wc2[:, 0])           # critic output weights
    w_pack = jnp.concatenate([w1, wh1, wh2], axis=1)              # (128, 512)

    vec = jnp.zeros((8, D0), jnp.float32)
    vec = vec.at[0, :].set(b1)
    vec = vec.at[1, :].set(g1)
    vec = vec.at[2, :].set(be1)
    vec = vec.at[3, :FEAT_DIM].set(b2)
    vec = vec.at[4, :FEAT_DIM].set(g2)
    vec = vec.at[5, :FEAT_DIM].set(be2)
    vec = vec.at[6, :ACTOR_DIM].set(ba1)
    vec = vec.at[6, ACTOR_DIM:HEAD_W].set(bc1)
    vec = vec.at[7, :ACTION_DIM].set(ba2)
    vec = vec.at[7, ACTION_DIM].set(bc2[0])

    return w_pack, w2, vec


def reference_forward(state, raw):
    """Pure-JAX fp32 reference matching the PyTorch forward (eval mode)."""
    (w1, b1, g1, be1, w2, b2, g2, be2,
     wa1, ba1, wa2, ba2, wc1, bc1, wc2, bc2) = raw
    h = jnp.maximum(_layernorm(state @ w1 + b1, g1, be1), 0.0)
    feat = jnp.maximum(_layernorm(h @ w2 + b2, g2, be2), 0.0)
    a = jnp.maximum(feat @ wa1 + ba1, 0.0)
    probs = jax.nn.softmax(a @ wa2 + ba2, axis=-1)
    c = jnp.maximum(feat @ wc1 + bc1, 0.0)
    value = c @ wc2 + bc2
    return probs, value


if __name__ == "__main__":
    key = jax.random.PRNGKey(0)
    k_state, k_params = jax.random.split(key)

    state = jax.random.normal(k_state, (BATCH, STATE_DIM), dtype=jnp.float32)
    raw = init_params(k_params)
    packed = pack_params(raw)

    # small-batch call (padded to one 128-row tile inside the wrapper)
    probs, value = adaptive_actor_critic_forward(state, packed)
    jax.block_until_ready((probs, value))

    probs_ref, value_ref = reference_forward(state, raw)
    np.testing.assert_allclose(np.asarray(probs), np.asarray(probs_ref), rtol=1e-4, atol=1e-5)
    np.testing.assert_allclose(np.asarray(value), np.asarray(value_ref), rtol=1e-4, atol=1e-4)
    assert probs.shape == (BATCH, ACTION_DIM) and value.shape == (BATCH, 1)
    np.testing.assert_allclose(np.asarray(probs).sum(-1), np.ones(BATCH), rtol=1e-5, atol=1e-5)

    # batched call exercising multiple grid tiles (parallel across cores on v7x)
    big_state = jax.random.normal(k_state, (2 * TM, STATE_DIM), dtype=jnp.float32)
    big_probs, big_value = adaptive_actor_critic_forward(big_state, packed)
    jax.block_until_ready((big_probs, big_value))
    bp_ref, bv_ref = reference_forward(big_state, raw)
    np.testing.assert_allclose(np.asarray(big_probs), np.asarray(bp_ref), rtol=1e-4, atol=1e-5)
    np.testing.assert_allclose(np.asarray(big_value), np.asarray(bv_ref), rtol=1e-4, atol=1e-4)

    print("KERNEL_OK")
</pallas_src>

<mosaic_0001>
module attributes {stable_mosaic.version = 11 : i64} {
  func.func @actor_critic_kernel(%arg0: i32, %arg1: memref<128x128xf32, #tpu.memory_space<vmem>>, %arg2: memref<128x512xf32, #tpu.memory_space<vmem>>, %arg3: memref<256x128xf32, #tpu.memory_space<vmem>>, %arg4: memref<8x256xf32, #tpu.memory_space<vmem>>, %arg5: memref<128x128xf32, #tpu.memory_space<vmem>>) attributes {dimension_semantics = [#tpu.dimension_semantics<parallel>], iteration_bounds = array<i64: 1>, scalar_prefetch = 0 : i64, scratch_operands = 0 : i64, tpu.core_type = #tpu.core_type<tc>, window_params = [{transform_indices = @transform_0, window_bounds = array<i64: 128, 128>}, {pipeline_mode = #tpu.pipeline_mode<synchronous>, transform_indices = @transform_1, window_bounds = array<i64: 128, 512>}, {pipeline_mode = #tpu.pipeline_mode<synchronous>, transform_indices = @transform_2, window_bounds = array<i64: 256, 128>}, {pipeline_mode = #tpu.pipeline_mode<synchronous>, transform_indices = @transform_3, window_bounds = array<i64: 8, 256>}, {transform_indices = @transform_4, window_bounds = array<i64: 128, 128>}]} {
    %c0 = arith.constant 0 : index
    %c0_0 = arith.constant 0 : index
    %0 = vector.load %arg1[%c0, %c0_0] : memref<128x128xf32, #tpu.memory_space<vmem>>, vector<128x128xf32>
    %c0_1 = arith.constant 0 : index
    %c0_2 = arith.constant 0 : index
    %1 = vector.load %arg2[%c0_1, %c0_2] : memref<128x512xf32, #tpu.memory_space<vmem>>, vector<128x256xf32>
    %c0_3 = arith.constant 0 : index
    %c256 = arith.constant 256 : index
    %2 = vector.load %arg2[%c0_3, %c256] : memref<128x512xf32, #tpu.memory_space<vmem>>, vector<128x128xf32>
    %c0_4 = arith.constant 0 : index
    %c384 = arith.constant 384 : index
    %3 = vector.load %arg2[%c0_4, %c384] : memref<128x512xf32, #tpu.memory_space<vmem>>, vector<128x128xf32>
    %c0_5 = arith.constant 0 : index
    %c0_6 = arith.constant 0 : index
    %4 = vector.load %arg4[%c0_5, %c0_6] : memref<8x256xf32, #tpu.memory_space<vmem>>, vector<1x256xf32>
    %c1 = arith.constant 1 : index
    %c0_7 = arith.constant 0 : index
    %5 = vector.load %arg4[%c1, %c0_7] : memref<8x256xf32, #tpu.memory_space<vmem>>, vector<1x256xf32>
    %c2 = arith.constant 2 : index
    %c0_8 = arith.constant 0 : index
    %6 = vector.load %arg4[%c2, %c0_8] : memref<8x256xf32, #tpu.memory_space<vmem>>, vector<1x256xf32>
    %c3 = arith.constant 3 : index
    %c0_9 = arith.constant 0 : index
    %7 = vector.load %arg4[%c3, %c0_9] : memref<8x256xf32, #tpu.memory_space<vmem>>, vector<1x128xf32>
    %c4 = arith.constant 4 : index
    %c0_10 = arith.constant 0 : index
    %8 = vector.load %arg4[%c4, %c0_10] : memref<8x256xf32, #tpu.memory_space<vmem>>, vector<1x128xf32>
    %c5 = arith.constant 5 : index
    %c0_11 = arith.constant 0 : index
    %9 = vector.load %arg4[%c5, %c0_11] : memref<8x256xf32, #tpu.memory_space<vmem>>, vector<1x128xf32>
    %c6 = arith.constant 6 : index
    %c0_12 = arith.constant 0 : index
    %10 = vector.load %arg4[%c6, %c0_12] : memref<8x256xf32, #tpu.memory_space<vmem>>, vector<1x128xf32>
    %c7 = arith.constant 7 : index
    %c0_13 = arith.constant 0 : index
    %11 = vector.load %arg4[%c7, %c0_13] : memref<8x256xf32, #tpu.memory_space<vmem>>, vector<1x128xf32>
    %cst = arith.constant dense<0.000000e+00> : vector<128x256xf32>
    %12 = tpu.matmul %0, %1, %cst {dimension_numbers = #tpu.dot_dimension_numbers<[1], [0], [0], [1], [0, 0, 1, 1], [], []>} : vector<128x128xf32>, vector<128x256xf32>, vector<128x256xf32> -> vector<128x256xf32>
    %13 = vector.broadcast %4 : vector<1x256xf32> to vector<128x256xf32>
    %14 = arith.addf %12, %13 : vector<128x256xf32>
    %cst_14 = arith.constant dense<0.000000e+00> : vector<128xf32>
    %15 = vector.multi_reduction <add>, %14, %cst_14 [1] : vector<128x256xf32> to vector<128xf32>
    %16 = vector.shape_cast %15 : vector<128xf32> to vector<128x1xf32>
    %cst_15 = arith.constant 2.560000e+02 : f32
    %17 = vector.broadcast %cst_15 : f32 to vector<128x1xf32>
    %18 = arith.divf %16, %17 : vector<128x1xf32>
    %19 = vector.broadcast %18 : vector<128x1xf32> to vector<128x256xf32>
    %20 = arith.subf %14, %19 : vector<128x256xf32>
    %21 = arith.mulf %20, %20 : vector<128x256xf32>
    %cst_16 = arith.constant dense<0.000000e+00> : vector<128xf32>
    %22 = vector.multi_reduction <add>, %21, %cst_16 [1] : vector<128x256xf32> to vector<128xf32>
    %23 = vector.shape_cast %22 : vector<128xf32> to vector<128x1xf32>
    %cst_17 = arith.constant 2.560000e+02 : f32
    %24 = vector.broadcast %cst_17 : f32 to vector<128x1xf32>
    %25 = arith.divf %23, %24 : vector<128x1xf32>
    %26 = vector.broadcast %18 : vector<128x1xf32> to vector<128x256xf32>
    %27 = arith.subf %14, %26 : vector<128x256xf32>
    %cst_18 = arith.constant 9.99999974E-6 : f32
    %28 = vector.broadcast %cst_18 : f32 to vector<128x1xf32>
    %29 = arith.addf %25, %28 : vector<128x1xf32>
    %30 = math.rsqrt %29 : vector<128x1xf32>
    %31 = vector.broadcast %30 : vector<128x1xf32> to vector<128x256xf32>
    %32 = arith.mulf %27, %31 : vector<128x256xf32>
    %33 = vector.broadcast %5 : vector<1x256xf32> to vector<128x256xf32>
    %34 = arith.mulf %32, %33 : vector<128x256xf32>
    %35 = vector.broadcast %6 : vector<1x256xf32> to vector<128x256xf32>
    %36 = arith.addf %34, %35 : vector<128x256xf32>
    %cst_19 = arith.constant 0.000000e+00 : f32
    %37 = vector.broadcast %cst_19 : f32 to vector<128x256xf32>
    %38 = arith.maximumf %36, %37 : vector<128x256xf32>
    %c0_20 = arith.constant 0 : index
    %c0_21 = arith.constant 0 : index
    %39 = vector.load %arg3[%c0_20, %c0_21] : memref<256x128xf32, #tpu.memory_space<vmem>>, vector<256x128xf32>
    %cst_22 = arith.constant dense<0.000000e+00> : vector<128x128xf32>
    %40 = tpu.matmul %38, %39, %cst_22 {dimension_numbers = #tpu.dot_dimension_numbers<[1], [0], [0], [1], [0, 0, 1, 1], [], []>} : vector<128x256xf32>, vector<256x128xf32>, vector<128x128xf32> -> vector<128x128xf32>
    %41 = vector.broadcast %7 : vector<1x128xf32> to vector<128x128xf32>
    %42 = arith.addf %40, %41 : vector<128x128xf32>
    %cst_23 = arith.constant dense<0.000000e+00> : vector<128xf32>
    %43 = vector.multi_reduction <add>, %42, %cst_23 [1] : vector<128x128xf32> to vector<128xf32>
    %44 = vector.shape_cast %43 : vector<128xf32> to vector<128x1xf32>
    %cst_24 = arith.constant 1.280000e+02 : f32
    %45 = vector.broadcast %cst_24 : f32 to vector<128x1xf32>
    %46 = arith.divf %44, %45 : vector<128x1xf32>
    %47 = vector.broadcast %46 : vector<128x1xf32> to vector<128x128xf32>
    %48 = arith.subf %42, %47 : vector<128x128xf32>
    %49 = arith.mulf %48, %48 : vector<128x128xf32>
    %cst_25 = arith.constant dense<0.000000e+00> : vector<128xf32>
    %50 = vector.multi_reduction <add>, %49, %cst_25 [1] : vector<128x128xf32> to vector<128xf32>
    %51 = vector.shape_cast %50 : vector<128xf32> to vector<128x1xf32>
    %cst_26 = arith.constant 1.280000e+02 : f32
    %52 = vector.broadcast %cst_26 : f32 to vector<128x1xf32>
    %53 = arith.divf %51, %52 : vector<128x1xf32>
    %54 = vector.broadcast %46 : vector<128x1xf32> to vector<128x128xf32>
    %55 = arith.subf %42, %54 : vector<128x128xf32>
    %cst_27 = arith.constant 9.99999974E-6 : f32
    %56 = vector.broadcast %cst_27 : f32 to vector<128x1xf32>
    %57 = arith.addf %53, %56 : vector<128x1xf32>
    %58 = math.rsqrt %57 : vector<128x1xf32>
    %59 = vector.broadcast %58 : vector<128x1xf32> to vector<128x128xf32>
    %60 = arith.mulf %55, %59 : vector<128x128xf32>
    %61 = vector.broadcast %8 : vector<1x128xf32> to vector<128x128xf32>
    %62 = arith.mulf %60, %61 : vector<128x128xf32>
    %63 = vector.broadcast %9 : vector<1x128xf32> to vector<128x128xf32>
    %64 = arith.addf %62, %63 : vector<128x128xf32>
    %cst_28 = arith.constant 0.000000e+00 : f32
    %65 = vector.broadcast %cst_28 : f32 to vector<128x128xf32>
    %66 = arith.maximumf %64, %65 : vector<128x128xf32>
    %cst_29 = arith.constant dense<0.000000e+00> : vector<128x128xf32>
    %67 = tpu.matmul %66, %2, %cst_29 {dimension_numbers = #tpu.dot_dimension_numbers<[1], [0], [0], [1], [0, 0, 1, 1], [], []>} : vector<128x128xf32>, vector<128x128xf32>, vector<128x128xf32> -> vector<128x128xf32>
    %68 = vector.broadcast %10 : vector<1x128xf32> to vector<128x128xf32>
    %69 = arith.addf %67, %68 : vector<128x128xf32>
    %cst_30 = arith.constant 0.000000e+00 : f32
    %70 = vector.broadcast %cst_30 : f32 to vector<128x128xf32>
    %71 = arith.maximumf %69, %70 : vector<128x128xf32>
    %cst_31 = arith.constant dense<0.000000e+00> : vector<128x128xf32>
    %72 = tpu.matmul %71, %3, %cst_31 {dimension_numbers = #tpu.dot_dimension_numbers<[1], [0], [0], [1], [0, 0, 1, 1], [], []>} : vector<128x128xf32>, vector<128x128xf32>, vector<128x128xf32> -> vector<128x128xf32>
    %73 = vector.broadcast %11 : vector<1x128xf32> to vector<128x128xf32>
    %74 = arith.addf %72, %73 : vector<128x128xf32>
    %75 = tpu.iota {dimensions = array<i32: 1>} : vector<128x128xi32>
    %c8_i32 = arith.constant 8 : i32
    %76 = vector.broadcast %c8_i32 : i32 to vector<128x128xi32>
    %77 = arith.cmpi slt, %75, %76 : vector<128x128xi32>
    %cst_32 = arith.constant 0xFF800000 : f32
    %78 = vector.broadcast %cst_32 : f32 to vector<128x128xf32>
    %79 = arith.select %77, %74, %78 : vector<128x128xi1>, vector<128x128xf32>
    %cst_33 = arith.constant dense<0xFF800000> : vector<128xf32>
    %80 = vector.multi_reduction <maximumf>, %79, %cst_33 [1] : vector<128x128xf32> to vector<128xf32>
    %81 = vector.shape_cast %80 : vector<128xf32> to vector<128x1xf32>
    %82 = vector.broadcast %81 : vector<128x1xf32> to vector<128x128xf32>
    %83 = arith.subf %79, %82 : vector<128x128xf32>
    %84 = math.exp %83 : vector<128x128xf32>
    %cst_34 = arith.constant dense<0.000000e+00> : vector<128xf32>
    %85 = vector.multi_reduction <add>, %84, %cst_34 [1] : vector<128x128xf32> to vector<128xf32>
    %86 = vector.shape_cast %85 : vector<128xf32> to vector<128x1xf32>
    %87 = tpu.reciprocal %86 : vector<128x1xf32> -> vector<128x1xf32>
    %88 = vector.broadcast %87 : vector<128x1xf32> to vector<128x128xf32>
    %89 = arith.mulf %84, %88 : vector<128x128xf32>
    %c8_i32_35 = arith.constant 8 : i32
    %90 = vector.broadcast %c8_i32_35 : i32 to vector<128x128xi32>
    %91 = arith.cmpi eq, %75, %90 : vector<128x128xi32>
    %92 = arith.select %91, %74, %89 : vector<128x128xi1>, vector<128x128xf32>
    %c0_36 = arith.constant 0 : index
    %c0_37 = arith.constant 0 : index
    %93 = vector.load %arg5[%c0_36, %c0_37] : memref<128x128xf32, #tpu.memory_space<vmem>>, vector<128x128xf32>
    tpu.vector_store %arg5[%c0_36, %c0_37], %92 {strides = array<i32>} : memref<128x128xf32, #tpu.memory_space<vmem>>, vector<128x128xf32>,
    return
  }
  func.func @transform_0(%arg0: i32) -> (i32, i32) {
    %c0_i32 = arith.constant 0 : i32
    %c0_i32_0 = arith.constant 0 : i32
    return %arg0, %c0_i32 : i32, i32
  }
  func.func @transform_1(%arg0: i32) -> (i32, i32) {
    %c0_i32 = arith.constant 0 : i32
    %c0_i32_0 = arith.constant 0 : i32
    %c0_i32_1 = arith.constant 0 : i32
    return %c0_i32, %c0_i32_0 : i32, i32
  }
  func.func @transform_2(%arg0: i32) -> (i32, i32) {
    %c0_i32 = arith.constant 0 : i32
    %c0_i32_0 = arith.constant 0 : i32
    %c0_i32_1 = arith.constant 0 : i32
    return %c0_i32, %c0_i32_0 : i32, i32
  }
  func.func @transform_3(%arg0: i32) -> (i32, i32) {
    %c0_i32 = arith.constant 0 : i32
    %c0_i32_0 = arith.constant 0 : i32
    %c0_i32_1 = arith.constant 0 : i32
    return %c0_i32, %c0_i32_0 : i32, i32
  }
  func.func @transform_4(%arg0: i32) -> (i32, i32) {
    %c0_i32 = arith.constant 0 : i32
    %c0_i32_0 = arith.constant 0 : i32
    return %arg0, %c0_i32 : i32, i32
  }
}

</mosaic_0001>

<bundles_post_ra>
// kernel: tpu_custom_call.1
= control target key start
LH: loop header
LB: loop body
LE: loop exit
PB: predicated region body
PF: predicated region fallthrough
CT: control target
= control target key end

     0   :  { %9 = vsyncpa [#allocation3], 0  ;;  %s3257_s0 = inlined_call_operand.hbm [shape: f32[128,128], index: 0, kind: input, shape index: {}]   ;;  %s3258_s1 = inlined_call_operand.hbm [shape: f32[128,512], index: 1, kind: input, shape index: {}]   ;;  %s3259_s2 = inlined_call_operand.hbm [shape: f32[256,128], index: 2, kind: input, shape index: {}]   ;;  %s3260_s3 = inlined_call_operand.hbm [shape: f32[8,256], index: 3, kind: input, shape index: {}]   ;;  %s3261_s4 = inlined_call_operand.hbm [shape: f32[128,128], index: 4, kind: output, shape index: {}]  }
   0x1   :  { %10 = vsyncpa [#allocation6], 0 }
   0x2   :  { %11 = vsyncpa [#allocation9], 0 }
   0x3   :  { %12 = vsyncpa [#allocation4], 0  ;;  %s2271_s15 = smov [#allocation5]   ;;  %s2153_s19 = scalar_lea.hbm %s3258_s1, 8192 }
   0x4   :  { %s30_s16 = sshll.u32 %s2271_s15, 4  ;;  %p2154_p0 = scmp.ne.s32.totalorder %s3258_s1, %s2153_s19  ;;  %s31_s16 = int_to_ptr.vmem [resolvable:$true] %s30_s16 }
   0x5   :  { %p2157_p1 = scmp.lt.u32.totalorder %s2153_s19, %s3258_s1 }
   0x7   :  { %p2159_p2 = pnand %p2157_p1, %p2154_p0 }
   0x9   :  { %2162 = shalt.err (!%p2159_p2)
}
   0xa   :  { %s2163_s24 = scalar_lea.vmem %s31_s16, 8192  ;;  %p2168_p4 = scmp.lt.s32.totalorder %s31_s16, %s31_s16 }
   0xb   :  { %p2164_p3 = scmp.ne.s32.totalorder %s31_s16, %s2163_s24  ;;  %p2169_p5 = scmp.lt.s32.totalorder %s2163_s24, %s2163_s24 }
   0xd   :  { %p2170_p6 = por %p2169_p5, %p2168_p4 }
   0xf   :  { %p2171_p7 = pnand %p2170_p6, %p2164_p3 }
  0x11   :  { %2174 = shalt.err (!%p2171_p7)
}
  0x12   :  { %s2272_s25 = smov 512   ;;  %s2273_s26 = smov 32  }
  0x13   :  { %36 = dma.hbm_to_vmem [thread:$0]  %s3258_s1, 8192, %s31_s16, [#allocation6], %s2272_s25, %s2272_s25, %s2273_s26  }
  0x14   :  { %s2274_s29 = smov [#allocation2]   ;;  %s2175_s7 = scalar_lea.hbm %s3257_s0, 2048 }
  0x15   :  { %s18_s30 = sshll.u32 %s2274_s29, 4  ;;  %p2176_p8 = scmp.ne.s32.totalorder %s3257_s0, %s2175_s7  ;;  %s19_s30 = int_to_ptr.vmem [resolvable:$true] %s18_s30 }
  0x16   :  { %p2179_p9 = scmp.lt.u32.totalorder %s2175_s7, %s3257_s0 }
  0x18   :  { %p2181_p10 = pnand %p2179_p9, %p2176_p8 }
  0x1a   :  { %2184 = shalt.err (!%p2181_p10)
}
  0x1b   :  { %s2185_s12 = scalar_lea.vmem %s19_s30, 2048  ;;  %p2190_p12 = scmp.lt.s32.totalorder %s19_s30, %s19_s30 }
  0x1c   :  { %p2186_p11 = scmp.ne.s32.totalorder %s19_s30, %s2185_s12  ;;  %p2191_p13 = scmp.lt.s32.totalorder %s2185_s12, %s2185_s12 }
  0x1e   :  { %p2192_p0 = por %p2191_p13, %p2190_p12 }
  0x20   :  { %p2193_p1 = pnand %p2192_p0, %p2186_p11 }
  0x22   :  { %2196 = shalt.err (!%p2193_p1)
}
  0x23   :  { %s2275_s1 = smov 128   ;;  %s2276_s13 = smov 8  }
  0x24   :  { %24 = dma.hbm_to_vmem [thread:$0]  %s3257_s0, 2048, %s19_s30, [#allocation3], %s2275_s1, %s2275_s1, %s2276_s13  }
  0x25   :  { %s2277_s16 = smov [#allocation7]   ;;  %s2278_s18 = smov [#allocation8]  }
  0x26   :  { %s42_s17 = sshll.u32 %s2277_s16, 4  ;;  %s55_s19 = sshll.u32 %s2278_s18, 4  ;;  %s43_s17 = int_to_ptr.vmem [resolvable:$true] %s42_s17  ;;  %s56_s19 = int_to_ptr.vmem [resolvable:$true] %s55_s19 }
  0x27   :  { %s2197_s22 = scalar_lea.hbm %s3259_s2, 4096 }
  0x28   :  { %p2198_p2 = scmp.ne.s32.totalorder %s3259_s2, %s2197_s22  ;;  %p2201_p3 = scmp.lt.u32.totalorder %s2197_s22, %s3259_s2 }
  0x2a   :  { %p2203_p4 = pnand %p2201_p3, %p2198_p2 }
  0x2c   :  { %2206 = shalt.err (!%p2203_p4)
}
  0x2d   :  { %s2207_s0 = scalar_lea.vmem %s43_s17, 4096  ;;  %p2212_p6 = scmp.lt.s32.totalorder %s43_s17, %s43_s17 }
  0x2e   :  { %p2208_p5 = scmp.ne.s32.totalorder %s43_s17, %s2207_s0  ;;  %p2213_p7 = scmp.lt.s32.totalorder %s2207_s0, %s2207_s0 }
  0x30   :  { %p2214_p8 = por %p2213_p7, %p2212_p6 }
  0x32   :  { %p2215_p9 = pnand %p2214_p8, %p2208_p5 }
  0x34   :  { %2218 = shalt.err (!%p2215_p9)
}
  0x35   :  { %48 = dma.hbm_to_vmem [thread:$0]  %s3259_s2, 4096, %s43_s17, [#allocation6], %s2275_s1, %s2275_s1, %s2276_s13  }
  0x36   :  { %s2219_s5 = scalar_lea.hbm %s3260_s3, 256 }
  0x37   :  { %p2220_p10 = scmp.ne.s32.totalorder %s3260_s3, %s2219_s5  ;;  %p2223_p11 = scmp.lt.u32.totalorder %s2219_s5, %s3260_s3 }
  0x39   :  { %p2225_p12 = pnand %p2223_p11, %p2220_p10 }
  0x3b   :  { %2228 = shalt.err (!%p2225_p12)
}
  0x3c   :  { %s2229_s10 = scalar_lea.vmem %s56_s19, 256  ;;  %p2234_p0 = scmp.lt.s32.totalorder %s56_s19, %s56_s19 }
  0x3d   :  { %p2230_p13 = scmp.ne.s32.totalorder %s56_s19, %s2229_s10  ;;  %p2235_p1 = scmp.lt.s32.totalorder %s2229_s10, %s2229_s10 }
  0x3f   :  { %p2236_p2 = por %p2235_p1, %p2234_p0 }
  0x41   :  { %p2237_p3 = pnand %p2236_p2, %p2230_p13 }
  0x43   :  { %2240 = shalt.err (!%p2237_p3)
}
  0x44   :  { %58 = dma.hbm_to_vmem [thread:$0]  %s3260_s3, 256, %s56_s19, [#allocation9]  }
  0x45   :  { %2263 = dma.done.wait [#allocation3], 2048  }
  0x46   :  { %2264 = vsyncadd [#allocation3], 4294965248 }
  0x47   :  { %2265 = dma.done.wait [#allocation6], 12288  }
  0x48   :  { %2266 = vsyncadd [#allocation6], 4294955008 }
  0x49   :  { %2267 = dma.done.wait [#allocation9], 256  }
  0x4a   :  { %2268 = vsyncadd [#allocation9], 4294967040  ;;  %v2279_v0 = vmov 0.0   ;;  %v88_v1 = vld [vmem:[#allocation5 + $0x8] sm:$0xff]  ;;  %v87_v3 = vld [vmem:[#allocation5] sm:$0xff]  ;;  %s2280_s3 = smov [#allocation10]  }
  0x4b   :  { %236 = vmatprep.mubr.f32.mxu0 %v2279_v0  ;;  %v90_v2 = vld [vmem:[#allocation5 + $0x28] sm:$0xff]  ;;  %v89_v5 = vld [vmem:[#allocation5 + $0x20] sm:$0xff]  ;;  %v73_v51 = vld [vmem:[#allocation2 + $0x10] sm:$0xff]  ;;  %s1617_s12 = sshll.u32 %s2280_s3, 4  ;;  %s1618_s12 = int_to_ptr.vmem [resolvable:$true] %s1617_s12 }
  0x4c   :  { %v1887_v4 = vpack.c.bf16 %v90_v2, %v88_v1  ;;  %v92_v6 = vld [vmem:[#allocation5 + $0x48] sm:$0xff]  ;;  %v1889_v8 = vpack.c.bf16 %v89_v5, %v87_v3  ;;  %v91_v10 = vld [vmem:[#allocation5 + $0x40] sm:$0xff]  ;;  %v74_v52 = vld [vmem:[#allocation2 + $0x18] sm:$0xff]  ;;  %v162_v2 = vlaneseq  ;;  %s2241_s14 = scalar_lea.vmem %s1618_s12, 2048  ;;  %p2246_p5 = scmp.lt.s32.totalorder %s1618_s12, %s1618_s12 }
  0x4d   :  { %v94_v7 = vld [vmem:[#allocation5 + $0x68] sm:$0xff]  ;;  %v93_v11 = vld [vmem:[#allocation5 + $0x60] sm:$0xff]  ;;  %v77_v55 = vld [vmem:[#allocation2 + $0x30] sm:$0xff]  ;;  %p2242_p4 = scmp.ne.s32.totalorder %s1618_s12, %s2241_s14  ;;  %p2247_p6 = scmp.lt.s32.totalorder %s2241_s14, %s2241_s14 }
  0x4e   :  { %v1891_v9 = vpack.c.bf16 %v94_v7, %v92_v6  ;;  %v96_v12 = vld [vmem:[#allocation5 + $0x88] sm:$0xff]  ;;  %1888 = vmatprep.subr.bf16.mxu0 %v1887_v4  ;;  %v1893_v14 = vpack.c.bf16 %v93_v11, %v91_v10  ;;  %v95_v16 = vld [vmem:[#allocation5 + $0x80] sm:$0xff]  ;;  %v78_v56 = vld [vmem:[#allocation2 + $0x38] sm:$0xff]  ;;  %v163_v3 = vshrl.u32 %v162_v2, 7 }
  0x4f   :  { %v98_v13 = vld [vmem:[#allocation5 + $0xa8] sm:$0xff]  ;;  %1890 = vmatpush1.bf16.msra.mxu0 %v1889_v8  ;;  %v97_v17 = vld [vmem:[#allocation5 + $0xa0] sm:$0xff]  ;;  %v81_v59 = vld [vmem:[#allocation2 + $0x50] sm:$0xff]  ;;  %p2248_p7 = por %p2247_p6, %p2246_p5 }
  0x50   :  { %1892 = vmatprep.subr.bf16.mxu0 %v1891_v9  ;;  %v1895_v15 = vpack.c.bf16 %v98_v13, %v96_v12  ;;  %v100_v18 = vld [vmem:[#allocation5 + $0xc8] sm:$0xff]  ;;  %v1897_v20 = vpack.c.bf16 %v97_v17, %v95_v16  ;;  %v99_v22 = vld [vmem:[#allocation5 + $0xc0] sm:$0xff]  ;;  %v82_v60 = vld [vmem:[#allocation2 + $0x58] sm:$0xff]  ;;  %v2377_v4 = vsub.s32 0, %v163_v3  ;;  %v2379_v6 = vsub.s32 1, %v163_v3 }
  0x51   :  { %v102_v19 = vld [vmem:[#allocation5 + $0xe8] sm:$0xff]  ;;  %v101_v23 = vld [vmem:[#allocation5 + $0xe0] sm:$0xff]  ;;  %v85_v63 = vld [vmem:[#allocation2 + $0x70] sm:$0xff]  ;;  %p2249_p8 = pnand %p2248_p7, %p2242_p4 }
  0x52   :  { %v1899_v21 = vpack.c.bf16 %v102_v19, %v100_v18  ;;  %v104_v24 = vld [vmem:[#allocation5 + $0x108] sm:$0xff]  ;;  %v1901_v26 = vpack.c.bf16 %v101_v23, %v99_v22  ;;  %v103_v28 = vld [vmem:[#allocation5 + $0x100] sm:$0xff]  ;;  %v86_v1 = vld [vmem:[#allocation2 + $0x78] sm:$0xff] }
  0x53   :  { %1894 = vmatpush1.bf16.msra.mxu0 %v1893_v14  ;;  %v106_v25 = vld [vmem:[#allocation5 + $0x128] sm:$0xff]  ;;  %v105_v29 = vld [vmem:[#allocation5 + $0x120] sm:$0xff] }
  0x54   :  { %1896 = vmatprep.subr.bf16.mxu0 %v1895_v15  ;;  %v1903_v27 = vpack.c.bf16 %v106_v25, %v104_v24  ;;  %v108_v30 = vld [vmem:[#allocation5 + $0x148] sm:$0xff]  ;;  %v1905_v32 = vpack.c.bf16 %v105_v29, %v103_v28  ;;  %v107_v34 = vld [vmem:[#allocation5 + $0x140] sm:$0xff] }
  0x55   :  { %v110_v31 = vld [vmem:[#allocation5 + $0x168] sm:$0xff]  ;;  %v109_v35 = vld [vmem:[#allocation5 + $0x160] sm:$0xff] }
  0x56   :  { %v1907_v33 = vpack.c.bf16 %v110_v31, %v108_v30  ;;  %v112_v36 = vld [vmem:[#allocation5 + $0x188] sm:$0xff]  ;;  %v1909_v38 = vpack.c.bf16 %v109_v35, %v107_v34  ;;  %v111_v40 = vld [vmem:[#allocation5 + $0x180] sm:$0xff] }
  0x57   :  { %1898 = vmatpush1.bf16.msra.mxu0 %v1897_v20  ;;  %v114_v37 = vld [vmem:[#allocation5 + $0x1a8] sm:$0xff]  ;;  %v113_v41 = vld [vmem:[#allocation5 + $0x1a0] sm:$0xff] }
  0x58   :  { %1900 = vmatprep.subr.bf16.mxu0 %v1899_v21  ;;  %v1911_v39 = vpack.c.bf16 %v114_v37, %v112_v36  ;;  %v116_v42 = vld [vmem:[#allocation5 + $0x1c8] sm:$0xff]  ;;  %v1913_v44 = vpack.c.bf16 %v113_v41, %v111_v40  ;;  %v115_v46 = vld [vmem:[#allocation5 + $0x1c0] sm:$0xff] }
  0x59   :  { %v118_v43 = vld [vmem:[#allocation5 + $0x1e8] sm:$0xff]  ;;  %v117_v47 = vld [vmem:[#allocation5 + $0x1e0] sm:$0xff] }
  0x5a   :  { %v1915_v45 = vpack.c.bf16 %v118_v43, %v116_v42  ;;  %v1917_v48 = vpack.c.bf16 %v117_v47, %v115_v46  ;;  %v71_v49 = vld [vmem:[#allocation2] sm:$0xff]  ;;  %v72_v50 = vld [vmem:[#allocation2 + $0x8] sm:$0xff] }
  0x5b   :  { %1902 = vmatpush1.bf16.msra.mxu0 %v1901_v26  ;;  %v75_v53 = vld [vmem:[#allocation2 + $0x20] sm:$0xff]  ;;  %v76_v54 = vld [vmem:[#allocation2 + $0x28] sm:$0xff] }
  0x5c   :  { %1904 = vmatprep.subr.bf16.mxu0 %v1903_v27  ;;  %v79_v57 = vld [vmem:[#allocation2 + $0x40] sm:$0xff]  ;;  %v80_v58 = vld [vmem:[#allocation2 + $0x48] sm:$0xff] }
  0x5d   :  { %v83_v61 = vld [vmem:[#allocation2 + $0x60] sm:$0xff]  ;;  %v84_v62 = vld [vmem:[#allocation2 + $0x68] sm:$0xff] }
  0x5e   :  { %v151_v5 = vld [vmem:[#allocation8] ss:$8 sm:$0x3] }
  0x5f   :  { %1906 = vmatpush1.bf16.msra.mxu0 %v1905_v32  ;;  %v2382_v7 = vrot.slane %v151_v5, %v2377_v4  ;;  %v2385_v8 = vrot.slane %v151_v5, %v2379_v6 }
  0x60   :  { %1908 = vmatprep.subr.bf16.mxu0 %v1907_v33 }
  0x63   :  { %1910 = vmatpush1.bf16.msra.mxu0 %v1909_v38 }
  0x64   :  { %1912 = vmatprep.subr.bf16.mxu0 %v1911_v39 }
  0x67   :  { %1914 = vmatpush1.bf16.msra.mxu0 %v1913_v44 }
  0x68   :  { %1916 = vmatprep.subr.bf16.mxu0 %v1915_v45 }
  0x6b   :  { %1918 = vmatpush1.bf16.msra.mxu0 %v1917_v48 }
  0x6e   :  { %237 = vmatmul.mubr.f32.vlgmr.msra.gmra.mrb[0].mxu0 %v71_v49 }
  0x6f   :  { %242 = vmatprep.mubr.f32.mxu0 %v2279_v0 }
  0x72   :  { %243 = vmatmul.mubr.f32.gmra.mrb[2].mxu0 %v72_v50 }
  0x73   :  { %248 = vmatprep.mubr.f32.mxu0 %v2279_v0 }
  0x76   :  { %249 = vmatmul.mubr.f32.gmra.mrb[4].mxu0 %v73_v51 }
  0x77   :  { %254 = vmatprep.mubr.f32.mxu0 %v2279_v0 }
  0x7a   :  { %255 = vmatmul.mubr.f32.gmra.mrb[6].mxu0 %v74_v52 }
  0x7b   :  { %260 = vmatprep.mubr.f32.mxu0 %v2279_v0 }
  0x7e   :  { %261 = vmatmul.mubr.f32.gmra.mrb[8].mxu0 %v75_v53 }
  0x7f   :  { %266 = vmatprep.mubr.f32.mxu0 %v2279_v0 }
  0x82   :  { %267 = vmatmul.mubr.f32.gmra.mrb[10].mxu0 %v76_v54 }
  0x83   :  { %272 = vmatprep.mubr.f32.mxu0 %v2279_v0 }
  0x86   :  { %273 = vmatmul.mubr.f32.gmra.mrb[12].mxu0 %v77_v55 }
  0x87   :  { %278 = vmatprep.mubr.f32.mxu0 %v2279_v0 }
  0x8a   :  { %279 = vmatmul.mubr.f32.gmra.mrb[14].mxu0 %v78_v56 }
  0x8b   :  { %284 = vmatprep.mubr.f32.mxu0 %v2279_v0 }
  0x8e   :  { %285 = vmatmul.mubr.f32.gmra.mrb[16].mxu0 %v79_v57 }
  0x8f   :  { %290 = vmatprep.mubr.f32.mxu0 %v2279_v0 }
  0x92   :  { %291 = vmatmul.mubr.f32.gmra.mrb[18].mxu0 %v80_v58 }
  0x93   :  { %296 = vmatprep.mubr.f32.mxu0 %v2279_v0 }
  0x96   :  { %297 = vmatmul.mubr.f32.gmra.mrb[20].mxu0 %v81_v59 }
  0x97   :  { %302 = vmatprep.mubr.f32.mxu0 %v2279_v0 }
  0x9a   :  { %303 = vmatmul.mubr.f32.gmra.mrb[22].mxu0 %v82_v60 }
  0x9b   :  { %308 = vmatprep.mubr.f32.mxu0 %v2279_v0 }
  0x9e   :  { %309 = vmatmul.mubr.f32.gmra.mrb[24].mxu0 %v83_v61 }
  0x9f   :  { %314 = vmatprep.mubr.f32.mxu0 %v2279_v0 }
  0xa2   :  { %315 = vmatmul.mubr.f32.gmra.mrb[26].mxu0 %v84_v62 }
  0xa3   :  { %320 = vmatprep.mubr.f32.mxu0 %v2279_v0 }
  0xa6   :  { %321 = vmatmul.mubr.f32.gmra.mrb[28].mxu0 %v85_v63 }
  0xa7   :  { %326 = vmatprep.mubr.f32.mxu0 %v2279_v0 }
  0xaa   :  { %327 = vmatmul.mubr.f32.gmra.mrb[30].mxu0 %v86_v1 }
 0x141   :  { %v238_v9 = vpop.f32.mrb[0].mxu0 }
 0x142   :  { %v2388_v10 = vadd.f32 %v238_v9, %v2382_v7  ;;  %v240_v0 = vpop.f32.mrb[1].mxu0 }
 0x143   :  { %v2391_v11 = vadd.f32 %v240_v0, %v2385_v8 }
 0x145   :  { %v244_v12 = vpop.f32.mrb[2].mxu0  ;;  %v333_v13 = vadd.f32 %v2391_v11, %v2388_v10 }
 0x146   :  { %v2396_v14 = vadd.f32 %v244_v12, %v2382_v7  ;;  %v246_v15 = vpop.f32.mrb[3].mxu0 }
 0x147   :  { %v2399_v16 = vadd.f32 %v246_v15, %v2385_v8  ;;  %334 = vadd.xlane.f32.xlu0 %v333_v13 }
 0x149   :  { %v250_v17 = vpop.f32.mrb[4].mxu0  ;;  %v336_v18 = vadd.f32 %v2399_v16, %v2396_v14 }
 0x14a   :  { %v2404_v19 = vadd.f32 %v250_v17, %v2382_v7  ;;  %v252_v20 = vpop.f32.mrb[5].mxu0 }
 0x14b   :  { %v2407_v21 = vadd.f32 %v252_v20, %v2385_v8  ;;  %337 = vadd.xlane.f32.xlu0 %v336_v18 }
 0x14d   :  { %v256_v22 = vpop.f32.mrb[6].mxu0  ;;  %v339_v23 = vadd.f32 %v2407_v21, %v2404_v19 }
 0x14e   :  { %v2412_v24 = vadd.f32 %v256_v22, %v2382_v7  ;;  %v258_v25 = vpop.f32.mrb[7].mxu0 }
 0x14f   :  { %v2415_v26 = vadd.f32 %v258_v25, %v2385_v8  ;;  %340 = vadd.xlane.f32.xlu1 %v339_v23 }
 0x151   :  { %v262_v27 = vpop.f32.mrb[8].mxu0  ;;  %v342_v28 = vadd.f32 %v2415_v26, %v2412_v24 }
 0x152   :  { %v2420_v29 = vadd.f32 %v262_v27, %v2382_v7  ;;  %v264_v30 = vpop.f32.mrb[9].mxu0 }
 0x153   :  { %v2423_v31 = vadd.f32 %v264_v30, %v2385_v8  ;;  %343 = vadd.xlane.f32.xlu1 %v342_v28 }
 0x155   :  { %v268_v32 = vpop.f32.mrb[10].mxu0  ;;  %v345_v33 = vadd.f32 %v2423_v31, %v2420_v29 }
 0x156   :  { %v2428_v34 = vadd.f32 %v268_v32, %v2382_v7  ;;  %v270_v35 = vpop.f32.mrb[11].mxu0 }
 0x157   :  { %v2431_v36 = vadd.f32 %v270_v35, %v2385_v8  ;;  %346 = vadd.xlane.f32.xlu0 %v345_v33 }
 0x159   :  { %v274_v37 = vpop.f32.mrb[12].mxu0  ;;  %v348_v38 = vadd.f32 %v2431_v36, %v2428_v34 }
 0x15a   :  { %v2436_v39 = vadd.f32 %v274_v37, %v2382_v7  ;;  %v276_v40 = vpop.f32.mrb[13].mxu0 }
 0x15b   :  { %v2439_v41 = vadd.f32 %v276_v40, %v2385_v8  ;;  %349 = vadd.xlane.f32.xlu1 %v348_v38 }
 0x15d   :  { %v280_v42 = vpop.f32.mrb[14].mxu0  ;;  %v351_v43 = vadd.f32 %v2439_v41, %v2436_v39 }
 0x15e   :  { %v2444_v44 = vadd.f32 %v280_v42, %v2382_v7  ;;  %v282_v45 = vpop.f32.mrb[15].mxu0 }
 0x15f   :  { %v2447_v46 = vadd.f32 %v282_v45, %v2385_v8  ;;  %352 = vadd.xlane.f32.xlu0 %v351_v43  ;;  %v724_v43 = vld [vmem:[#allocation7 + $0x80] sm:$0xff]  ;;  %v725_v45 = vld [vmem:[#allocation7 + $0x88] sm:$0xff] }
 0x161   :  { %v286_v47 = vpop.f32.mrb[16].mxu0  ;;  %v354_v48 = vadd.f32 %v2447_v46, %v2444_v44 }
 0x162   :  { %v2452_v49 = vadd.f32 %v286_v47, %v2382_v7  ;;  %v288_v50 = vpop.f32.mrb[17].mxu0  ;;  %v708_v47 = vld [vmem:[#allocation7] sm:$0xff] }
 0x163   :  { %v2455_v51 = vadd.f32 %v288_v50, %v2385_v8  ;;  %355 = vadd.xlane.f32.xlu1 %v354_v48  ;;  %v1919_v48 = vpack.c.bf16 %v725_v45, %v724_v43  ;;  %v709_v50 = vld [vmem:[#allocation7 + $0x8] sm:$0xff] }
 0x165   :  { %v292_v52 = vpop.f32.mrb[18].mxu0  ;;  %v357_v53 = vadd.f32 %v2455_v51, %v2452_v49  ;;  %1920 = vmatprep.subr.bf16.mxu1 %v1919_v48 }
 0x166   :  { %v2460_v54 = vadd.f32 %v292_v52, %v2382_v7  ;;  %v294_v55 = vpop.f32.mrb[19].mxu0  ;;  %v726_v52 = vld [vmem:[#allocation7 + $0x90] sm:$0xff] }
 0x167   :  { %v2463_v56 = vadd.f32 %v294_v55, %v2385_v8  ;;  %358 = vadd.xlane.f32.xlu0 %v357_v53  ;;  %v727_v53 = vld [vmem:[#allocation7 + $0x98] sm:$0xff]  ;;  %v1921_v55 = vpack.c.bf16 %v709_v50, %v708_v47 }
 0x169   :  { %v298_v57 = vpop.f32.mrb[20].mxu0  ;;  %v360_v58 = vadd.f32 %v2463_v56, %v2460_v54  ;;  %1922 = vmatpush3.bf16.msra.mxu1 %v1921_v55 }
 0x16a   :  { %v2468_v59 = vadd.f32 %v298_v57, %v2382_v7  ;;  %v300_v60 = vpop.f32.mrb[21].mxu0  ;;  %v1923_v57 = vpack.c.bf16 %v727_v53, %v726_v52 }
 0x16b   :  { %v2471_v61 = vadd.f32 %v300_v60, %v2385_v8  ;;  %361 = vadd.xlane.f32.xlu1 %v360_v58  ;;  %v711_v58 = vld [vmem:[#allocation7 + $0x18] sm:$0xff] }
 0x16c   :  { %1924 = vmatprep.subr.bf16.mxu1 %v1923_v57 }
 0x16d   :  { %v304_v62 = vpop.f32.mrb[22].mxu0  ;;  %v363_v63 = vadd.f32 %v2471_v61, %v2468_v59 }
 0x16e   :  { %v2476_v1 = vadd.f32 %v304_v62, %v2382_v7  ;;  %v306_v3 = vpop.f32.mrb[23].mxu0 }
 0x16f   :  { %v2479_v5 = vadd.f32 %v306_v3, %v2385_v8  ;;  %364 = vadd.xlane.f32.xlu0 %v363_v63 }
 0x171   :  { %v310_v9 = vpop.f32.mrb[24].mxu0  ;;  %v366_v0 = vadd.f32 %v2479_v5, %v2476_v1 }
 0x172   :  { %v2484_v12 = vadd.f32 %v310_v9, %v2382_v7  ;;  %v312_v13 = vpop.f32.mrb[25].mxu0 }
 0x173   :  { %v2487_v15 = vadd.f32 %v312_v13, %v2385_v8  ;;  %367 = vadd.xlane.f32.xlu1 %v366_v0 }
 0x175   :  { %v316_v17 = vpop.f32.mrb[26].mxu0  ;;  %v369_v18 = vadd.f32 %v2487_v15, %v2484_v12 }
 0x176   :  { %v2492_v20 = vadd.f32 %v316_v17, %v2382_v7  ;;  %v318_v22 = vpop.f32.mrb[27].mxu0 }
 0x177   :  { %v2495_v23 = vadd.f32 %v318_v22, %v2385_v8  ;;  %370 = vadd.xlane.f32.xlu0 %v369_v18 }
 0x179   :  { %v322_v25 = vpop.f32.mrb[28].mxu0  ;;  %v372_v27 = vadd.f32 %v2495_v23, %v2492_v20 }
 0x17a   :  { %v2500_v28 = vadd.f32 %v322_v25, %v2382_v7  ;;  %v324_v30 = vpop.f32.mrb[29].mxu0 }
 0x17b   :  { %v2503_v32 = vadd.f32 %v324_v30, %v2385_v8  ;;  %373 = vadd.xlane.f32.xlu1 %v372_v27 }
 0x17d   :  { %v328_v33 = vpop.f32.mrb[30].mxu0  ;;  %v375_v35 = vadd.f32 %v2503_v32, %v2500_v28 }
 0x17e   :  { %v2508_v37 = vadd.f32 %v328_v33, %v2382_v7  ;;  %v330_v38 = vpop.f32.mrb[31].mxu0  ;;  %v710_v7 = vld [vmem:[#allocation7 + $0x10] sm:$0xff] }
 0x17f   :  { %v2511_v40 = vadd.f32 %v330_v38, %v2385_v8  ;;  %376 = vadd.xlane.f32.xlu0 %v375_v35  ;;  %v1925_v8 = vpack.c.bf16 %v711_v58, %v710_v7  ;;  %v729_v7 = vld [vmem:[#allocation7 + $0xa8] sm:$0xff] }
 0x181   :  { %v378_v42 = vadd.f32 %v2511_v40, %v2508_v37  ;;  %1926 = vmatpush3.bf16.msra.mxu1 %v1925_v8 }
 0x183   :  { %379 = vadd.xlane.f32.xlu1 %v378_v42 }
 0x1d4   :  { %v335_v60 = vpop.xlane.xlu0 %334 }
 0x1d5   :  { %v382_v62 = vmul.f32 0.00390625, %v335_v60 }
 0x1d7   :  { %v2516_v63 = vsub.f32 %v2388_v10, %v382_v62  ;;  %v2519_v3 = vsub.f32 %v2391_v11, %v382_v62 }
 0x1d8   :  { %v338_v9 = vpop.xlane.xlu0 %337 }
 0x1d9   :  { %v383_v0 = vmul.f32 0.00390625, %v338_v9  ;;  %v430_v13 = vmul.f32 %v2516_v63, %v2516_v63  ;;  %v431_v17 = vmul.f32 %v2519_v3, %v2519_v3  ;;  %v712_v9 = vld [vmem:[#allocation7 + $0x20] sm:$0xff] }
 0x1db   :  { %v2526_v18 = vsub.f32 %v2396_v14, %v383_v0  ;;  %v2529_v22 = vsub.f32 %v2399_v16, %v383_v0  ;;  %v462_v25 = vadd.f32 %v431_v17, %v430_v13  ;;  %v713_v0 = vld [vmem:[#allocation7 + $0x28] sm:$0xff] }
 0x1dc   :  { %v341_v10 = vpop.xlane.xlu1 %340 }
 0x1dd   :  { %v384_v27 = vmul.f32 0.00390625, %v341_v10  ;;  %463 = vadd.xlane.f32.xlu0 %v462_v25  ;;  %v432_v11 = vmul.f32 %v2526_v18, %v2526_v18  ;;  %v433_v30 = vmul.f32 %v2529_v22, %v2529_v22  ;;  %v730_v10 = vld [vmem:[#allocation7 + $0xb0] sm:$0xff] }
 0x1df   :  { %v2536_v33 = vsub.f32 %v2404_v19, %v384_v27  ;;  %v2539_v35 = vsub.f32 %v2407_v21, %v384_v27  ;;  %v465_v14 = vadd.f32 %v433_v30, %v432_v11  ;;  %v731_v27 = vld [vmem:[#allocation7 + $0xb8] sm:$0xff] }
 0x1e0   :  { %v344_v38 = vpop.xlane.xlu1 %343 }
 0x1e1   :  { %v385_v16 = vmul.f32 0.00390625, %v344_v38  ;;  %466 = vadd.xlane.f32.xlu1 %v465_v14  ;;  %v434_v42 = vmul.f32 %v2536_v33, %v2536_v33  ;;  %v435_v43 = vmul.f32 %v2539_v35, %v2539_v35  ;;  %v1931_v38 = vpack.c.bf16 %v731_v27, %v730_v10  ;;  %v719_v27 = vld [vmem:[#allocation7 + $0x58] sm:$0xff] }
 0x1e3   :  { %v2546_v45 = vsub.f32 %v2412_v24, %v385_v16  ;;  %v2549_v47 = vsub.f32 %v2415_v26, %v385_v16  ;;  %v468_v19 = vadd.f32 %v435_v43, %v434_v42  ;;  %v728_v26 = vld [vmem:[#allocation7 + $0xa0] sm:$0xff]  ;;  %v715_v16 = vld [vmem:[#allocation7 + $0x38] sm:$0xff] }
 0x1e4   :  { %v347_v48 = vpop.xlane.xlu0 %346  ;;  %v1927_v62 = vpack.c.bf16 %v729_v7, %v728_v26  ;;  %v717_v7 = vld [vmem:[#allocation7 + $0x48] sm:$0xff] }
 0x1e5   :  { %v386_v21 = vmul.f32 0.00390625, %v347_v48  ;;  %469 = vadd.xlane.f32.xlu0 %v468_v19  ;;  %v436_v50 = vmul.f32 %v2546_v45, %v2546_v45  ;;  %v437_v52 = vmul.f32 %v2549_v47, %v2549_v47 }
 0x1e6   :  { %1928 = vmatprep.subr.bf16.mxu1 %v1927_v62 }
 0x1e7   :  { %v2556_v53 = vsub.f32 %v2420_v29, %v386_v21  ;;  %v2559_v55 = vsub.f32 %v2423_v31, %v386_v21  ;;  %v471_v24 = vadd.f32 %v437_v52, %v436_v50  ;;  %v1929_v29 = vpack.c.bf16 %v713_v0, %v712_v9  ;;  %v732_v21 = vld [vmem:[#allocation7 + $0xc0] sm:$0xff]  ;;  %v733_v50 = vld [vmem:[#allocation7 + $0xc8] sm:$0xff]  ;;  %v734_v9 = vld [vmem:[#allocation7 + $0xd0] sm:$0xff] }
 0x1e8   :  { %v350_v57 = vpop.xlane.xlu1 %349  ;;  %v1935_v26 = vpack.c.bf16 %v733_v50, %v732_v21  ;;  %v735_v0 = vld [vmem:[#allocation7 + $0xd8] sm:$0xff]  ;;  %v721_v50 = vld [vmem:[#allocation7 + $0x68] sm:$0xff] }
 0x1e9   :  { %v387_v58 = vmul.f32 0.00390625, %v350_v57  ;;  %472 = vadd.xlane.f32.xlu1 %v471_v24  ;;  %v438_v8 = vmul.f32 %v2556_v53, %v2556_v53  ;;  %v439_v60 = vmul.f32 %v2559_v55, %v2559_v55  ;;  %1930 = vmatpush3.bf16.msra.mxu1 %v1929_v29  ;;  %v1939_v10 = vpack.c.bf16 %v735_v0, %v734_v9  ;;  %v723_v0 = vld [vmem:[#allocation7 + $0x78] sm:$0xff] }
 0x1ea   :  { %1932 = vmatprep.subr.bf16.mxu1 %v1931_v38 }
 0x1eb   :  { %v2566_v13 = vsub.f32 %v2428_v34, %v387_v58  ;;  %v2569_v31 = vsub.f32 %v2431_v36, %v387_v58  ;;  %v474_v17 = vadd.f32 %v439_v60, %v438_v8  ;;  %v714_v34 = vld [vmem:[#allocation7 + $0x30] sm:$0xff] }
 0x1ec   :  { %v353_v25 = vpop.xlane.xlu0 %352  ;;  %v1933_v42 = vpack.c.bf16 %v715_v16, %v714_v34  ;;  %v736_v34 = vld [vmem:[#allocation7 + $0xe0] sm:$0xff]  ;;  %v737_v16 = vld [vmem:[#allocation7 + $0xe8] sm:$0xff] }
 0x1ed   :  { %v388_v11 = vmul.f32 0.00390625, %v353_v25  ;;  %475 = vadd.xlane.f32.xlu0 %v474_v17  ;;  %v440_v30 = vmul.f32 %v2566_v13, %v2566_v13  ;;  %v441_v14 = vmul.f32 %v2569_v31, %v2569_v31  ;;  %v1943_v21 = vpack.c.bf16 %v737_v16, %v736_v34 }
 0x1ee   :  { %1934 = vmatpush3.bf16.msra.mxu1 %v1933_v42 }
 0x1ef   :  { %v2576_v36 = vsub.f32 %v2436_v39, %v388_v11  ;;  %v2579_v43 = vsub.f32 %v2439_v41, %v388_v11  ;;  %v477_v19 = vadd.f32 %v441_v14, %v440_v30  ;;  %v716_v39 = vld [vmem:[#allocation7 + $0x40] sm:$0xff]  ;;  %1936 = vmatprep.subr.bf16.mxu1 %v1935_v26 }
 0x1f0   :  { %v356_v48 = vpop.xlane.xlu1 %355  ;;  %v1937_v58 = vpack.c.bf16 %v717_v7, %v716_v39  ;;  %v738_v39 = vld [vmem:[#allocation7 + $0xf0] sm:$0xff]  ;;  %v739_v7 = vld [vmem:[#allocation7 + $0xf8] sm:$0xff] }
 0x1f1   :  { %v389_v52 = vmul.f32 0.00390625, %v356_v48  ;;  %478 = vadd.xlane.f32.xlu1 %v477_v19  ;;  %v442_v24 = vmul.f32 %v2576_v36, %v2576_v36  ;;  %v443_v57 = vmul.f32 %v2579_v43, %v2579_v43  ;;  %v1947_v9 = vpack.c.bf16 %v739_v7, %v738_v39 }
 0x1f2   :  { %1938 = vmatpush3.bf16.msra.mxu1 %v1937_v58 }
 0x1f3   :  { %v2586_v41 = vsub.f32 %v2444_v44, %v389_v52  ;;  %v2589_v8 = vsub.f32 %v2447_v46, %v389_v52  ;;  %v480_v60 = vadd.f32 %v443_v57, %v442_v24  ;;  %v718_v44 = vld [vmem:[#allocation7 + $0x50] sm:$0xff]  ;;  %1940 = vmatprep.subr.bf16.mxu1 %v1939_v10 }
 0x1f4   :  { %v359_v62 = vpop.xlane.xlu0 %358  ;;  %v1941_v11 = vpack.c.bf16 %v719_v27, %v718_v44 }
 0x1f5   :  { %v390_v29 = vmul.f32 0.00390625, %v359_v62  ;;  %481 = vadd.xlane.f32.xlu0 %v480_v60  ;;  %v444_v17 = vmul.f32 %v2586_v41, %v2586_v41  ;;  %v445_v25 = vmul.f32 %v2589_v8, %v2589_v8 }
 0x1f6   :  { %1942 = vmatpush3.bf16.msra.mxu1 %v1941_v11 }
 0x1f7   :  { %v2596_v46 = vsub.f32 %v2452_v49, %v390_v29  ;;  %v2599_v30 = vsub.f32 %v2455_v51, %v390_v29  ;;  %v483_v14 = vadd.f32 %v445_v25, %v444_v17  ;;  %v720_v49 = vld [vmem:[#allocation7 + $0x60] sm:$0xff]  ;;  %1944 = vmatprep.subr.bf16.mxu1 %v1943_v21 }
 0x1f8   :  { %v362_v38 = vpop.xlane.xlu1 %361  ;;  %v1945_v52 = vpack.c.bf16 %v721_v50, %v720_v49 }
 0x1f9   :  { %v391_v42 = vmul.f32 0.00390625, %v362_v38  ;;  %484 = vadd.xlane.f32.xlu1 %v483_v14  ;;  %v446_v19 = vmul.f32 %v2596_v46, %v2596_v46  ;;  %v447_v48 = vmul.f32 %v2599_v30, %v2599_v30 }
 0x1fa   :  { %1946 = vmatpush3.bf16.msra.mxu1 %v1945_v52 }
 0x1fb   :  { %v2606_v51 = vsub.f32 %v2460_v54, %v391_v42  ;;  %v2609_v24 = vsub.f32 %v2463_v56, %v391_v42  ;;  %v486_v57 = vadd.f32 %v447_v48, %v446_v19  ;;  %v722_v54 = vld [vmem:[#allocation7 + $0x70] sm:$0xff]  ;;  %1948 = vmatprep.subr.bf16.mxu1 %v1947_v9 }
 0x1fc   :  { %v365_v26 = vpop.xlane.xlu0 %364  ;;  %v1949_v29 = vpack.c.bf16 %v723_v0, %v722_v54 }
 0x1fd   :  { %v392_v58 = vmul.f32 0.00390625, %v365_v26  ;;  %487 = vadd.xlane.f32.xlu0 %v486_v57  ;;  %v448_v60 = vmul.f32 %v2606_v51, %v2606_v51  ;;  %v449_v62 = vmul.f32 %v2609_v24, %v2609_v24 }
 0x1fe   :  { %1950 = vmatpush3.bf16.msra.mxu1 %v1949_v29 }
 0x1ff   :  { %v2616_v56 = vsub.f32 %v2468_v59, %v392_v58  ;;  %v2619_v17 = vsub.f32 %v2471_v61, %v392_v58  ;;  %v489_v25 = vadd.f32 %v449_v62, %v448_v60 }
 0x200   :  { %v368_v10 = vpop.xlane.xlu1 %367 }
 0x201   :  { %v393_v44 = vmul.f32 0.00390625, %v368_v10  ;;  %490 = vadd.xlane.f32.xlu1 %v489_v25  ;;  %v450_v27 = vmul.f32 %v2616_v56, %v2616_v56  ;;  %v451_v11 = vmul.f32 %v2619_v17, %v2619_v17 }
 0x203   :  { %v2626_v14 = vsub.f32 %v2476_v1, %v393_v44  ;;  %v2629_v59 = vsub.f32 %v2479_v5, %v393_v44  ;;  %v492_v61 = vadd.f32 %v451_v11, %v450_v27 }
 0x204   :  { %v371_v38 = vpop.xlane.xlu0 %370 }
 0x205   :  { %v394_v34 = vmul.f32 0.00390625, %v371_v38  ;;  %493 = vadd.xlane.f32.xlu0 %v492_v61  ;;  %v452_v16 = vmul.f32 %v2626_v14, %v2626_v14  ;;  %v453_v42 = vmul.f32 %v2629_v59, %v2629_v59 }
 0x207   :  { %v2636_v19 = vsub.f32 %v2484_v12, %v394_v34  ;;  %v2639_v48 = vsub.f32 %v2487_v15, %v394_v34  ;;  %v495_v1 = vadd.f32 %v453_v42, %v452_v16  ;;  %v153_v42 = vld [vmem:[#allocation8 + $0x1] ss:$8 sm:$0x3] }
 0x208   :  { %v374_v21 = vpop.xlane.xlu1 %373 }
 0x209   :  { %v395_v5 = vmul.f32 0.00390625, %v374_v21  ;;  %496 = vadd.xlane.f32.xlu1 %v495_v1  ;;  %v454_v49 = vmul.f32 %v2636_v19, %v2636_v19  ;;  %v455_v50 = vmul.f32 %v2639_v48, %v2639_v48 }
 0x20b   :  { %v2646_v52 = vsub.f32 %v2492_v20, %v395_v5  ;;  %v2649_v57 = vsub.f32 %v2495_v23, %v395_v5  ;;  %v498_v12 = vadd.f32 %v455_v50, %v454_v49  ;;  %v155_v5 = vld [vmem:[#allocation8 + $0x2] ss:$8 sm:$0x3]  ;;  %v2676_v49 = vrot.slane %v153_v42, %v2377_v4 }
 0x20c   :  { %v377_v26 = vpop.xlane.xlu0 %376  ;;  %v2679_v50 = vrot.slane %v153_v42, %v2379_v6 }
 0x20d   :  { %v396_v15 = vmul.f32 0.00390625, %v377_v26  ;;  %499 = vadd.xlane.f32.xlu0 %v498_v12  ;;  %v456_v39 = vmul.f32 %v2646_v52, %v2646_v52  ;;  %v457_v7 = vmul.f32 %v2649_v57, %v2649_v57 }
 0x20f   :  { %v2656_v58 = vsub.f32 %v2500_v28, %v396_v15  ;;  %v2659_v60 = vsub.f32 %v2503_v32, %v396_v15  ;;  %v501_v20 = vadd.f32 %v457_v7, %v456_v39  ;;  %v2683_v7 = vrot.slane %v155_v5, %v2377_v4 }
 0x210   :  { %v380_v62 = vpop.xlane.xlu1 %379 }
 0x211   :  { %v397_v23 = vmul.f32 0.00390625, %v380_v62  ;;  %502 = vadd.xlane.f32.xlu1 %v501_v20  ;;  %v458_v9 = vmul.f32 %v2656_v58, %v2656_v58  ;;  %v459_v54 = vmul.f32 %v2659_v60, %v2659_v60  ;;  %v2686_v20 = vrot.slane %v155_v5, %v2379_v6 }
 0x213   :  { %v2666_v0 = vsub.f32 %v2508_v37, %v397_v23  ;;  %v2669_v29 = vsub.f32 %v2511_v40, %v397_v23  ;;  %v504_v28 = vadd.f32 %v459_v54, %v458_v9 }
 0x215   :  { %505 = vadd.xlane.f32.xlu0 %v504_v28  ;;  %v460_v32 = vmul.f32 %v2666_v0, %v2666_v0  ;;  %v461_v25 = vmul.f32 %v2669_v29, %v2669_v29 }
 0x217   :  { %v507_v10 = vadd.f32 %v461_v25, %v460_v32 }
 0x219   :  { %508 = vadd.xlane.f32.xlu1 %v507_v10 }
 0x26a   :  { %v464_v44 = vpop.xlane.xlu0 %463 }
 0x26b   :  { %v510_v27 = vmul.f32 0.00390625, %v464_v44 }
 0x26d   :  { %v526_v11 = vadd.f32 1e-05, %v510_v27 }
 0x26e   :  { %v467_v61 = vpop.xlane.xlu1 %466 }
 0x26f   :  { %2025 = vrsqrt.f32 %v526_v11  ;;  %v511_v37 = vmul.f32 0.00390625, %v467_v61 }
 0x271   :  { %v527_v38 = vadd.f32 1e-05, %v511_v37 }
 0x272   :  { %v470_v34 = vpop.xlane.xlu0 %469 }
 0x273   :  { %2027 = vrsqrt.f32 %v527_v38  ;;  %v512_v40 = vmul.f32 0.00390625, %v470_v34 }
 0x275   :  { %v528_v16 = vadd.f32 1e-05, %v512_v40 }
 0x276   :  { %v473_v1 = vpop.xlane.xlu1 %472 }
 0x277   :  { %2029 = vrsqrt.f32 %v528_v16  ;;  %v513_v21 = vmul.f32 0.00390625, %v473_v1 }
 0x279   :  { %v2026_v12 = vpop.eup %2025  ;;  %v529_v26 = vadd.f32 1e-05, %v513_v21 }
 0x27a   :  { %v476_v15 = vpop.xlane.xlu0 %475  ;;  %v559_v39 = vmul.f32 %v2026_v12, %v2519_v3  ;;  %v558_v62 = vmul.f32 %v2026_v12, %v2516_v63 }
 0x27b   :  { %2031 = vrsqrt.f32 %v529_v26  ;;  %v514_v23 = vmul.f32 0.00390625, %v476_v15 }
 0x27c   :  { %v602_v9 = vmul.f32 %v2679_v50, %v559_v39  ;;  %v601_v54 = vmul.f32 %v2676_v49, %v558_v62 }
 0x27d   :  { %v2028_v28 = vpop.eup %2027  ;;  %v530_v32 = vadd.f32 1e-05, %v514_v23 }
 0x27e   :  { %v479_v25 = vpop.xlane.xlu1 %478  ;;  %v645_v10 = vadd.f32 %v2686_v20, %v602_v9  ;;  %v644_v3 = vadd.f32 %v2683_v7, %v601_v54  ;;  %v561_v4 = vmul.f32 %v2028_v28, %v2529_v22  ;;  %v560_v6 = vmul.f32 %v2028_v28, %v2526_v18 }
 0x27f   :  { %2033 = vrsqrt.f32 %v530_v32  ;;  %v515_v44 = vmul.f32 0.00390625, %v479_v25 }
 0x280   :  { %v677_v63 = vmax.f32 %v645_v10, 0.0  ;;  %v676_v27 = vmax.f32 %v644_v3, 0.0  ;;  %v604_v11 = vmul.f32 %v2679_v50, %v561_v4  ;;  %v603_v61 = vmul.f32 %v2676_v49, %v560_v6 }
 0x281   :  { %v2030_v37 = vpop.eup %2029  ;;  %v531_v38 = vadd.f32 1e-05, %v515_v44 }
 0x282   :  { %804 = vmatprep.mubr.f32.mxu1 %v677_v63  ;;  %v482_v34 = vpop.xlane.xlu0 %481  ;;  %v647_v40 = vadd.f32 %v2686_v20, %v604_v11  ;;  %v646_v16 = vadd.f32 %v2683_v7, %v603_v61  ;;  %v563_v22 = vmul.f32 %v2030_v37, %v2539_v35  ;;  %v562_v18 = vmul.f32 %v2030_v37, %v2536_v33 }
 0x283   :  { %2035 = vrsqrt.f32 %v531_v38  ;;  %v516_v42 = vmul.f32 0.00390625, %v482_v34  ;;  %805 = vmatmul.mubr.f32.vlgmr.msra.gmra.mrb[0].mxu1 %v676_v27 }
 0x284   :  { %v679_v1 = vmax.f32 %v647_v40, 0.0  ;;  %v678_v21 = vmax.f32 %v646_v16, 0.0  ;;  %v606_v5 = vmul.f32 %v2679_v50, %v563_v22  ;;  %v605_v12 = vmul.f32 %v2676_v49, %v562_v18 }
 0x285   :  { %v2032_v26 = vpop.eup %2031  ;;  %v532_v15 = vadd.f32 1e-05, %v516_v42 }
 0x286   :  { %v485_v39 = vpop.xlane.xlu1 %484  ;;  %809 = vmatprep.mubr.f32.mxu1 %v679_v1  ;;  %v649_v62 = vadd.f32 %v2686_v20, %v606_v5  ;;  %v648_v23 = vadd.f32 %v2683_v7, %v605_v12  ;;  %v565_v35 = vmul.f32 %v2032_v26, %v2549_v47  ;;  %v564_v33 = vmul.f32 %v2032_v26, %v2546_v45 }
 0x287   :  { %2037 = vrsqrt.f32 %v532_v15  ;;  %v517_v9 = vmul.f32 0.00390625, %v485_v39  ;;  %810 = vmatmul.mubr.f32.gmra.mrb[2].mxu1 %v678_v21 }
 0x288   :  { %v681_v54 = vmax.f32 %v649_v62, 0.0  ;;  %v680_v28 = vmax.f32 %v648_v23, 0.0  ;;  %v608_v32 = vmul.f32 %v2679_v50, %v565_v35  ;;  %v607_v25 = vmul.f32 %v2676_v49, %v564_v33 }
 0x289   :  { %v2034_v10 = vpop.eup %2033  ;;  %v533_v3 = vadd.f32 1e-05, %v517_v9 }
 0x28a   :  { %814 = vmatprep.mubr.f32.mxu1 %v681_v54  ;;  %v488_v4 = vpop.xlane.xlu0 %487  ;;  %v651_v6 = vadd.f32 %v2686_v20, %v608_v32  ;;  %v650_v44 = vadd.f32 %v2683_v7, %v607_v25  ;;  %v567_v47 = vmul.f32 %v2034_v10, %v2559_v55  ;;  %v566_v45 = vmul.f32 %v2034_v10, %v2556_v53 }
 0x28b   :  { %2039 = vrsqrt.f32 %v533_v3  ;;  %v518_v63 = vmul.f32 0.00390625, %v488_v4  ;;  %815 = vmatmul.mubr.f32.gmra.mrb[4].mxu1 %v680_v28 }
 0x28c   :  { %v683_v27 = vmax.f32 %v651_v6, 0.0  ;;  %v682_v11 = vmax.f32 %v650_v44, 0.0  ;;  %v610_v61 = vmul.f32 %v2679_v50, %v567_v47  ;;  %v609_v37 = vmul.f32 %v2676_v49, %v566_v45 }
 0x28d   :  { %v2036_v38 = vpop.eup %2035  ;;  %v534_v34 = vadd.f32 1e-05, %v518_v63 }
 0x28e   :  { %v491_v40 = vpop.xlane.xlu1 %490  ;;  %819 = vmatprep.mubr.f32.mxu1 %v683_v27  ;;  %v653_v16 = vadd.f32 %v2686_v20, %v610_v61  ;;  %v652_v22 = vadd.f32 %v2683_v7, %v609_v37  ;;  %v569_v55 = vmul.f32 %v2036_v38, %v2569_v31  ;;  %v568_v53 = vmul.f32 %v2036_v38, %v2566_v13 }
 0x28f   :  { %2041 = vrsqrt.f32 %v534_v34  ;;  %v519_v18 = vmul.f32 0.00390625, %v491_v40  ;;  %820 = vmatmul.mubr.f32.gmra.mrb[6].mxu1 %v682_v11 }
 0x290   :  { %v685_v42 = vmax.f32 %v653_v16, 0.0  ;;  %v684_v1 = vmax.f32 %v652_v22, 0.0  ;;  %v612_v21 = vmul.f32 %v2679_v50, %v569_v55  ;;  %v611_v5 = vmul.f32 %v2676_v49, %v568_v53 }
 0x291   :  { %v2038_v12 = vpop.eup %2037  ;;  %v535_v26 = vadd.f32 1e-05, %v519_v18 }
 0x292   :  { %824 = vmatprep.mubr.f32.mxu1 %v685_v42  ;;  %v494_v15 = vpop.xlane.xlu0 %493  ;;  %v655_v39 = vadd.f32 %v2686_v20, %v612_v21  ;;  %v654_v62 = vadd.f32 %v2683_v7, %v611_v5  ;;  %v571_v31 = vmul.f32 %v2038_v12, %v2579_v43  ;;  %v570_v13 = vmul.f32 %v2038_v12, %v2576_v36 }
 0x293   :  { %2043 = vrsqrt.f32 %v535_v26  ;;  %v520_v23 = vmul.f32 0.00390625, %v494_v15  ;;  %825 = vmatmul.mubr.f32.gmra.mrb[8].mxu1 %v684_v1 }
 0x294   :  { %v687_v35 = vmax.f32 %v655_v39, 0.0  ;;  %v686_v33 = vmax.f32 %v654_v62, 0.0  ;;  %v614_v9 = vmul.f32 %v2679_v50, %v571_v31  ;;  %v613_v54 = vmul.f32 %v2676_v49, %v570_v13 }
 0x295   :  { %v2040_v28 = vpop.eup %2039  ;;  %v536_v32 = vadd.f32 1e-05, %v520_v23 }
 0x296   :  { %v497_v25 = vpop.xlane.xlu1 %496  ;;  %829 = vmatprep.mubr.f32.mxu1 %v687_v35  ;;  %v657_v10 = vadd.f32 %v2686_v20, %v614_v9  ;;  %v656_v3 = vadd.f32 %v2683_v7, %v613_v54  ;;  %v573_v43 = vmul.f32 %v2040_v28, %v2589_v8  ;;  %v572_v36 = vmul.f32 %v2040_v28, %v2586_v41 }
 0x297   :  { %2045 = vrsqrt.f32 %v536_v32  ;;  %v521_v4 = vmul.f32 0.00390625, %v497_v25  ;;  %830 = vmatmul.mubr.f32.gmra.mrb[10].mxu1 %v686_v33 }
 0x298   :  { %v689_v6 = vmax.f32 %v657_v10, 0.0  ;;  %v688_v44 = vmax.f32 %v656_v3, 0.0  ;;  %v616_v47 = vmul.f32 %v2679_v50, %v573_v43  ;;  %v615_v45 = vmul.f32 %v2676_v49, %v572_v36 }
 0x299   :  { %v2042_v63 = vpop.eup %2041  ;;  %v537_v27 = vadd.f32 1e-05, %v521_v4 }
 0x29a   :  { %834 = vmatprep.mubr.f32.mxu1 %v689_v6  ;;  %v500_v11 = vpop.xlane.xlu0 %499  ;;  %v659_v61 = vadd.f32 %v2686_v20, %v616_v47  ;;  %v658_v37 = vadd.f32 %v2683_v7, %v615_v45  ;;  %v575_v8 = vmul.f32 %v2042_v63, %v2599_v30  ;;  %v574_v41 = vmul.f32 %v2042_v63, %v2596_v46 }
 0x29b   :  { %2047 = vrsqrt.f32 %v537_v27  ;;  %v522_v38 = vmul.f32 0.00390625, %v500_v11  ;;  %835 = vmatmul.mubr.f32.gmra.mrb[12].mxu1 %v688_v44 }
 0x29c   :  { %v691_v34 = vmax.f32 %v659_v61, 0.0  ;;  %v690_v40 = vmax.f32 %v658_v37, 0.0  ;;  %v618_v16 = vmul.f32 %v2679_v50, %v575_v8  ;;  %v617_v22 = vmul.f32 %v2676_v49, %v574_v41 }
 0x29d   :  { %v2044_v55 = vpop.eup %2043  ;;  %v538_v53 = vadd.f32 1e-05, %v522_v38 }
 0x29e   :  { %v503_v18 = vpop.xlane.xlu1 %502  ;;  %839 = vmatprep.mubr.f32.mxu1 %v691_v34  ;;  %v661_v42 = vadd.f32 %v2686_v20, %v618_v16  ;;  %v660_v1 = vadd.f32 %v2683_v7, %v617_v22  ;;  %v577_v30 = vmul.f32 %v2044_v55, %v2609_v24  ;;  %v576_v46 = vmul.f32 %v2044_v55, %v2606_v51 }
 0x29f   :  { %2049 = vrsqrt.f32 %v538_v53  ;;  %v523_v21 = vmul.f32 0.00390625, %v503_v18  ;;  %840 = vmatmul.mubr.f32.gmra.mrb[14].mxu1 %v690_v40 }
 0x2a0   :  { %v693_v5 = vmax.f32 %v661_v42, 0.0  ;;  %v692_v12 = vmax.f32 %v660_v1, 0.0  ;;  %v620_v26 = vmul.f32 %v2679_v50, %v577_v30  ;;  %v619_v15 = vmul.f32 %v2676_v49, %v576_v46 }
 0x2a1   :  { %v2046_v39 = vpop.eup %2045  ;;  %v539_v62 = vadd.f32 1e-05, %v523_v21 }
 0x2a2   :  { %844 = vmatprep.mubr.f32.mxu1 %v693_v5  ;;  %v506_v31 = vpop.xlane.xlu0 %505  ;;  %v663_v13 = vadd.f32 %v2686_v20, %v620_v26  ;;  %v662_v23 = vadd.f32 %v2683_v7, %v619_v15  ;;  %v579_v24 = vmul.f32 %v2046_v39, %v2619_v17  ;;  %v578_v51 = vmul.f32 %v2046_v39, %v2616_v56 }
 0x2a3   :  { %2051 = vrsqrt.f32 %v539_v62  ;;  %v524_v35 = vmul.f32 0.00390625, %v506_v31  ;;  %845 = vmatmul.mubr.f32.gmra.mrb[16].mxu1 %v692_v12 }
 0x2a4   :  { %v695_v33 = vmax.f32 %v663_v13, 0.0  ;;  %v694_v9 = vmax.f32 %v662_v23, 0.0  ;;  %v622_v54 = vmul.f32 %v2679_v50, %v579_v24  ;;  %v621_v28 = vmul.f32 %v2676_v49, %v578_v51 }
 0x2a5   :  { %v2048_v32 = vpop.eup %2047  ;;  %v540_v25 = vadd.f32 1e-05, %v524_v35 }
 0x2a6   :  { %v509_v10 = vpop.xlane.xlu1 %508  ;;  %849 = vmatprep.mubr.f32.mxu1 %v695_v33  ;;  %v665_v3 = vadd.f32 %v2686_v20, %v622_v54  ;;  %v664_v43 = vadd.f32 %v2683_v7, %v621_v28  ;;  %v581_v17 = vmul.f32 %v2048_v32, %v2629_v59  ;;  %v580_v56 = vmul.f32 %v2048_v32, %v2626_v14 }
 0x2a7   :  { %2053 = vrsqrt.f32 %v540_v25  ;;  %v525_v36 = vmul.f32 0.00390625, %v509_v10  ;;  %850 = vmatmul.mubr.f32.gmra.mrb[18].mxu1 %v694_v9 }
 0x2a8   :  { %v697_v4 = vmax.f32 %v665_v3, 0.0  ;;  %v696_v6 = vmax.f32 %v664_v43, 0.0  ;;  %v624_v44 = vmul.f32 %v2679_v50, %v581_v17  ;;  %v623_v47 = vmul.f32 %v2676_v49, %v580_v56 }
 0x2a9   :  { %v2050_v45 = vpop.eup %2049  ;;  %v541_v63 = vadd.f32 1e-05, %v525_v36 }
 0x2aa   :  { %854 = vmatprep.mubr.f32.mxu1 %v697_v4  ;;  %v667_v27 = vadd.f32 %v2686_v20, %v624_v44  ;;  %v666_v11 = vadd.f32 %v2683_v7, %v623_v47  ;;  %v583_v59 = vmul.f32 %v2050_v45, %v2639_v48  ;;  %v582_v14 = vmul.f32 %v2050_v45, %v2636_v19 }
 0x2ab   :  { %2055 = vrsqrt.f32 %v541_v63  ;;  %855 = vmatmul.mubr.f32.gmra.mrb[20].mxu1 %v696_v6 }
 0x2ac   :  { %v699_v61 = vmax.f32 %v667_v27, 0.0  ;;  %v698_v37 = vmax.f32 %v666_v11, 0.0  ;;  %v626_v8 = vmul.f32 %v2679_v50, %v583_v59  ;;  %v625_v41 = vmul.f32 %v2676_v49, %v582_v14 }
 0x2ad   :  { %v2052_v38 = vpop.eup %2051 }
 0x2ae   :  { %859 = vmatprep.mubr.f32.mxu1 %v699_v61  ;;  %v669_v34 = vadd.f32 %v2686_v20, %v626_v8  ;;  %v668_v40 = vadd.f32 %v2683_v7, %v625_v41  ;;  %v585_v16 = vmul.f32 %v2052_v38, %v2649_v57  ;;  %v584_v48 = vmul.f32 %v2052_v38, %v2646_v52 }
 0x2af   :  { %860 = vmatmul.mubr.f32.gmra.mrb[22].mxu1 %v698_v37 }
 0x2b0   :  { %v701_v19 = vmax.f32 %v669_v34, 0.0  ;;  %v700_v22 = vmax.f32 %v668_v40, 0.0  ;;  %v628_v55 = vmul.f32 %v2679_v50, %v585_v16  ;;  %v627_v53 = vmul.f32 %v2676_v49, %v584_v48 }
 0x2b1   :  { %v2054_v18 = vpop.eup %2053 }
 0x2b2   :  { %864 = vmatprep.mubr.f32.mxu1 %v701_v19  ;;  %v671_v42 = vadd.f32 %v2686_v20, %v628_v55  ;;  %v670_v1 = vadd.f32 %v2683_v7, %v627_v53  ;;  %v587_v30 = vmul.f32 %v2054_v18, %v2659_v60  ;;  %v586_v46 = vmul.f32 %v2054_v18, %v2656_v58 }
 0x2b3   :  { %865 = vmatmul.mubr.f32.gmra.mrb[24].mxu1 %v700_v22 }
 0x2b4   :  { %v703_v57 = vmax.f32 %v671_v42, 0.0  ;;  %v702_v52 = vmax.f32 %v670_v1, 0.0  ;;  %v630_v21 = vmul.f32 %v2679_v50, %v587_v30  ;;  %v629_v5 = vmul.f32 %v2676_v49, %v586_v46 }
 0x2b5   :  { %v2056_v12 = vpop.eup %2055 }
 0x2b6   :  { %869 = vmatprep.mubr.f32.mxu1 %v703_v57  ;;  %v673_v26 = vadd.f32 %v2686_v20, %v630_v21  ;;  %v672_v15 = vadd.f32 %v2683_v7, %v629_v5  ;;  %v589_v39 = vmul.f32 %v2056_v12, %v2669_v29  ;;  %v588_v62 = vmul.f32 %v2056_v12, %v2666_v0  ;;  %v2783_v0 = vld [vmem:[#allocation8 + $0x3] ss:$0 sm:$0xff] }
 0x2b7   :  { %870 = vmatmul.mubr.f32.gmra.mrb[26].mxu1 %v702_v52 }
 0x2b8   :  { %v705_v60 = vmax.f32 %v673_v26, 0.0  ;;  %v704_v58 = vmax.f32 %v672_v15, 0.0  ;;  %v632_v31 = vmul.f32 %v2679_v50, %v589_v39  ;;  %v631_v13 = vmul.f32 %v2676_v49, %v588_v62 }
 0x2ba   :  { %874 = vmatprep.mubr.f32.mxu1 %v705_v60  ;;  %v675_v23 = vadd.f32 %v2686_v20, %v632_v31  ;;  %v674_v24 = vadd.f32 %v2683_v7, %v631_v13 }
 0x2bb   :  { %875 = vmatmul.mubr.f32.gmra.mrb[28].mxu1 %v704_v58 }
 0x2bc   :  { %v707_v51 = vmax.f32 %v675_v23, 0.0  ;;  %v706_v35 = vmax.f32 %v674_v24, 0.0 }
 0x2be   :  { %879 = vmatprep.mubr.f32.mxu1 %v707_v51 }
 0x2bf   :  { %880 = vmatmul.mubr.f32.gmra.mrb[30].mxu1 %v706_v35 }
 0x356   :  { %v1663_v29 = vpop.f32.mrb[0].mxu1 }
 0x357   :  { %v1664_v33 = vpop.f32.mrb[1].mxu1 }
 0x358   :  { %v1665_v9 = vadd.f32 %v1664_v33, %v1663_v29 }
 0x35a   :  { %v1666_v54 = vpop.f32.mrb[2].mxu1  ;;  %v2786_v50 = vadd.f32 %v1665_v9, %v2783_v0  ;;  %v119_v9 = vld [vmem:[#allocation5 + $0x10] sm:$0xff] }
 0x35b   :  { %v1667_v49 = vpop.f32.mrb[3].mxu1 }
 0x35c   :  { %v1668_v28 = vadd.f32 %v1667_v49, %v1666_v54  ;;  %885 = vadd.xlane.f32.xlu0 %v2786_v50  ;;  %v120_v54 = vld [vmem:[#allocation5 + $0x30] sm:$0xff] }
 0x35d   :  { %v121_v49 = vld [vmem:[#allocation5 + $0x50] sm:$0xff] }
 0x35e   :  { %v1669_v20 = vpop.f32.mrb[4].mxu1  ;;  %v2790_v7 = vadd.f32 %v1668_v28, %v2783_v0  ;;  %v1951_v28 = vpack.c.bf16 %v120_v54, %v119_v9  ;;  %v131_v54 = vld [vmem:[#allocation5 + $0x190] sm:$0xff] }
 0x35f   :  { %v1670_v32 = vpop.f32.mrb[5].mxu1 }
 0x360   :  { %v1671_v25 = vadd.f32 %v1670_v32, %v1669_v20  ;;  %887 = vadd.xlane.f32.xlu1 %v2790_v7  ;;  %v122_v20 = vld [vmem:[#allocation5 + $0x70] sm:$0xff]  ;;  %1952 = vmatprep.subr.bf16.mxu0 %v1951_v28 }
 0x361   :  { %v1955_v32 = vpack.c.bf16 %v122_v20, %v121_v49  ;;  %1954 = vmatpush3.bf16.msra.mxu0 %v1951_v28  ;;  %v132_v49 = vld [vmem:[#allocation5 + $0x1b0] sm:$0xff] }
 0x362   :  { %v1672_v10 = vpop.f32.mrb[6].mxu1  ;;  %v2794_v3 = vadd.f32 %v1671_v25, %v2783_v0  ;;  %v1975_v28 = vpack.c.bf16 %v132_v49, %v131_v54 }
 0x363   :  { %v1673_v43 = vpop.f32.mrb[7].mxu1  ;;  %1956 = vmatprep.subr.bf16.mxu0 %v1955_v32 }
 0x364   :  { %v1674_v17 = vadd.f32 %v1673_v43, %v1672_v10  ;;  %889 = vadd.xlane.f32.xlu0 %v2794_v3 }
 0x365   :  { %1958 = vmatpush3.bf16.msra.mxu0 %v1955_v32 }
 0x366   :  { %v1675_v56 = vpop.f32.mrb[8].mxu1  ;;  %v2798_v36 = vadd.f32 %v1674_v17, %v2783_v0 }
 0x367   :  { %v1676_v4 = vpop.f32.mrb[9].mxu1 }
 0x368   :  { %v1677_v6 = vadd.f32 %v1676_v4, %v1675_v56  ;;  %891 = vadd.xlane.f32.xlu1 %v2798_v36 }
 0x36a   :  { %v1678_v44 = vpop.f32.mrb[10].mxu1  ;;  %v2802_v47 = vadd.f32 %v1677_v6, %v2783_v0 }
 0x36b   :  { %v1679_v45 = vpop.f32.mrb[11].mxu1 }
 0x36c   :  { %v1680_v63 = vadd.f32 %v1679_v45, %v1678_v44  ;;  %893 = vadd.xlane.f32.xlu0 %v2802_v47 }
 0x36e   :  { %v1681_v27 = vpop.f32.mrb[12].mxu1  ;;  %v2806_v11 = vadd.f32 %v1680_v63, %v2783_v0 }
 0x36f   :  { %v1682_v59 = vpop.f32.mrb[13].mxu1 }
 0x370   :  { %v1683_v14 = vadd.f32 %v1682_v59, %v1681_v27  ;;  %895 = vadd.xlane.f32.xlu1 %v2806_v11 }
 0x372   :  { %v1684_v61 = vpop.f32.mrb[14].mxu1  ;;  %v2810_v37 = vadd.f32 %v1683_v14, %v2783_v0 }
 0x373   :  { %v1685_v8 = vpop.f32.mrb[15].mxu1 }
 0x374   :  { %v1686_v41 = vadd.f32 %v1685_v8, %v1684_v61  ;;  %897 = vadd.xlane.f32.xlu0 %v2810_v37 }
 0x376   :  { %v1687_v38 = vpop.f32.mrb[16].mxu1  ;;  %v2814_v34 = vadd.f32 %v1686_v41, %v2783_v0 }
 0x377   :  { %v1688_v40 = vpop.f32.mrb[17].mxu1 }
 0x378   :  { %v1689_v16 = vadd.f32 %v1688_v40, %v1687_v38  ;;  %899 = vadd.xlane.f32.xlu1 %v2814_v34 }
 0x37a   :  { %v1690_v48 = vpop.f32.mrb[18].mxu1  ;;  %v2818_v19 = vadd.f32 %v1689_v16, %v2783_v0  ;;  %v123_v16 = vld [vmem:[#allocation5 + $0x90] sm:$0xff] }
 0x37b   :  { %v1691_v22 = vpop.f32.mrb[19].mxu1 }
 0x37c   :  { %v1692_v55 = vadd.f32 %v1691_v22, %v1690_v48  ;;  %901 = vadd.xlane.f32.xlu0 %v2818_v19  ;;  %v124_v48 = vld [vmem:[#allocation5 + $0xb0] sm:$0xff] }
 0x37d   :  { %v1959_v22 = vpack.c.bf16 %v124_v48, %v123_v16 }
 0x37e   :  { %v1693_v53 = vpop.f32.mrb[20].mxu1  ;;  %v2822_v18 = vadd.f32 %v1692_v55, %v2783_v0 }
 0x37f   :  { %v1694_v42 = vpop.f32.mrb[21].mxu1  ;;  %1960 = vmatprep.subr.bf16.mxu0 %v1959_v22 }
 0x380   :  { %v1695_v1 = vadd.f32 %v1694_v42, %v1693_v53  ;;  %903 = vadd.xlane.f32.xlu1 %v2822_v18  ;;  %1962 = vmatpush3.bf16.msra.mxu0 %v1959_v22  ;;  %v125_v42 = vld [vmem:[#allocation5 + $0xd0] sm:$0xff] }
 0x382   :  { %v1696_v30 = vpop.f32.mrb[22].mxu1  ;;  %v2826_v46 = vadd.f32 %v1695_v1, %v2783_v0  ;;  %v126_v1 = vld [vmem:[#allocation5 + $0xf0] sm:$0xff] }
 0x383   :  { %v1697_v57 = vpop.f32.mrb[23].mxu1 }
 0x384   :  { %v1698_v52 = vadd.f32 %v1697_v57, %v1696_v30  ;;  %905 = vadd.xlane.f32.xlu0 %v2826_v46  ;;  %v1963_v30 = vpack.c.bf16 %v126_v1, %v125_v42  ;;  %v137_v42 = vld [vmem:[#allocation5 + $0x58] sm:$0xff] }
 0x386   :  { %v1699_v21 = vpop.f32.mrb[24].mxu1  ;;  %v2830_v5 = vadd.f32 %v1698_v52, %v2783_v0  ;;  %1964 = vmatprep.subr.bf16.mxu0 %v1963_v30 }
 0x387   :  { %v1700_v12 = vpop.f32.mrb[25].mxu1  ;;  %1966 = vmatpush3.bf16.msra.mxu0 %v1963_v30 }
 0x388   :  { %v1701_v26 = vadd.f32 %v1700_v12, %v1699_v21  ;;  %907 = vadd.xlane.f32.xlu1 %v2830_v5  ;;  %v127_v12 = vld [vmem:[#allocation5 + $0x110] sm:$0xff] }
 0x38a   :  { %v1702_v15 = vpop.f32.mrb[26].mxu1  ;;  %v2834_v39 = vadd.f32 %v1701_v26, %v2783_v0  ;;  %v128_v26 = vld [vmem:[#allocation5 + $0x130] sm:$0xff] }
 0x38b   :  { %v1703_v62 = vpop.f32.mrb[27].mxu1 }
 0x38c   :  { %v1704_v60 = vadd.f32 %v1703_v62, %v1702_v15  ;;  %909 = vadd.xlane.f32.xlu0 %v2834_v39  ;;  %v1967_v15 = vpack.c.bf16 %v128_v26, %v127_v12  ;;  %v141_v12 = vld [vmem:[#allocation5 + $0xd8] sm:$0xff] }
 0x38e   :  { %v1705_v58 = vpop.f32.mrb[28].mxu1  ;;  %v2838_v31 = vadd.f32 %v1704_v60, %v2783_v0  ;;  %1968 = vmatprep.subr.bf16.mxu0 %v1967_v15 }
 0x38f   :  { %v1706_v13 = vpop.f32.mrb[29].mxu1  ;;  %1970 = vmatpush3.bf16.msra.mxu0 %v1967_v15  ;;  %v143_v15 = vld [vmem:[#allocation5 + $0x118] sm:$0xff] }
 0x390   :  { %v1707_v23 = vadd.f32 %v1706_v13, %v1705_v58  ;;  %911 = vadd.xlane.f32.xlu1 %v2838_v31  ;;  %v129_v13 = vld [vmem:[#allocation5 + $0x150] sm:$0xff] }
 0x392   :  { %v1708_v24 = vpop.f32.mrb[30].mxu1  ;;  %v2842_v51 = vadd.f32 %v1707_v23, %v2783_v0  ;;  %v130_v23 = vld [vmem:[#allocation5 + $0x170] sm:$0xff] }
 0x393   :  { %v1709_v35 = vpop.f32.mrb[31].mxu1 }
 0x394   :  { %v1710_v29 = vadd.f32 %v1709_v35, %v1708_v24  ;;  %913 = vadd.xlane.f32.xlu0 %v2842_v51  ;;  %v1971_v24 = vpack.c.bf16 %v130_v23, %v129_v13  ;;  %v146_v13 = vld [vmem:[#allocation5 + $0x178] sm:$0xff] }
 0x396   :  { %v2846_v33 = vadd.f32 %v1710_v29, %v2783_v0  ;;  %1972 = vmatprep.subr.bf16.mxu0 %v1971_v24 }
 0x397   :  { %1974 = vmatpush3.bf16.msra.mxu0 %v1971_v24  ;;  %v147_v24 = vld [vmem:[#allocation5 + $0x198] sm:$0xff] }
 0x398   :  { %915 = vadd.xlane.f32.xlu1 %v2846_v33  ;;  %1976 = vmatprep.subr.bf16.mxu0 %v1975_v28 }
 0x39b   :  { %1978 = vmatpush3.bf16.msra.mxu0 %v1975_v28 }
 0x3e9   :  { %v886_v25 = vpop.xlane.xlu0 %885 }
 0x3ea   :  { %v918_v10 = vmul.f32 0.0078125, %v886_v25 }
 0x3ec   :  { %v2850_v43 = vsub.f32 %v2786_v50, %v918_v10  ;;  %v133_v10 = vld [vmem:[#allocation5 + $0x1d0] sm:$0xff] }
 0x3ed   :  { %v888_v17 = vpop.xlane.xlu1 %887 }
 0x3ee   :  { %v919_v0 = vmul.f32 0.0078125, %v888_v17  ;;  %v950_v56 = vmul.f32 %v2850_v43, %v2850_v43  ;;  %v134_v17 = vld [vmem:[#allocation5 + $0x1f0] sm:$0xff] }
 0x3f0   :  { %v2855_v4 = vsub.f32 %v2790_v7, %v919_v0  ;;  %966 = vadd.xlane.f32.xlu0 %v950_v56  ;;  %v1979_v0 = vpack.c.bf16 %v134_v17, %v133_v10 }
 0x3f1   :  { %v890_v6 = vpop.xlane.xlu0 %889 }
 0x3f2   :  { %v920_v44 = vmul.f32 0.0078125, %v890_v6  ;;  %v951_v45 = vmul.f32 %v2855_v4, %v2855_v4  ;;  %1980 = vmatprep.subr.bf16.mxu0 %v1979_v0 }
 0x3f3   :  { %1982 = vmatpush3.bf16.msra.mxu0 %v1979_v0 }
 0x3f4   :  { %v2860_v63 = vsub.f32 %v2794_v3, %v920_v44  ;;  %968 = vadd.xlane.f32.xlu1 %v951_v45 }
 0x3f5   :  { %v892_v50 = vpop.xlane.xlu1 %891 }
 0x3f6   :  { %v921_v27 = vmul.f32 0.0078125, %v892_v50  ;;  %v952_v59 = vmul.f32 %v2860_v63, %v2860_v63 }
 0x3f8   :  { %v2865_v14 = vsub.f32 %v2798_v36, %v921_v27  ;;  %970 = vadd.xlane.f32.xlu0 %v952_v59 }
 0x3f9   :  { %v894_v7 = vpop.xlane.xlu0 %893 }
 0x3fa   :  { %v922_v61 = vmul.f32 0.0078125, %v894_v7  ;;  %v953_v8 = vmul.f32 %v2865_v14, %v2865_v14 }
 0x3fc   :  { %v2870_v41 = vsub.f32 %v2802_v47, %v922_v61  ;;  %972 = vadd.xlane.f32.xlu1 %v953_v8 }
 0x3fd   :  { %v896_v3 = vpop.xlane.xlu1 %895 }
 0x3fe   :  { %v923_v38 = vmul.f32 0.0078125, %v896_v3  ;;  %v954_v40 = vmul.f32 %v2870_v41, %v2870_v41 }
 0x400   :  { %v2875_v36 = vsub.f32 %v2806_v11, %v923_v38  ;;  %974 = vadd.xlane.f32.xlu0 %v954_v40 }
 0x401   :  { %v898_v55 = vpop.xlane.xlu0 %897 }
 0x402   :  { %v924_v53 = vmul.f32 0.0078125, %v898_v55  ;;  %v955_v47 = vmul.f32 %v2875_v36, %v2875_v36 }
 0x404   :  { %v2880_v57 = vsub.f32 %v2810_v37, %v924_v53  ;;  %976 = vadd.xlane.f32.xlu1 %v955_v47  ;;  %v135_v53 = vld [vmem:[#allocation5 + $0x18] sm:$0xff] }
 0x405   :  { %v900_v52 = vpop.xlane.xlu1 %899  ;;  %v136_v47 = vld [vmem:[#allocation5 + $0x38] sm:$0xff] }
 0x406   :  { %v925_v21 = vmul.f32 0.0078125, %v900_v52  ;;  %v956_v11 = vmul.f32 %v2880_v57, %v2880_v57  ;;  %v1983_v1 = vpack.c.bf16 %v136_v47, %v135_v53  ;;  %v139_v52 = vld [vmem:[#allocation5 + $0x98] sm:$0xff] }
 0x408   :  { %v2885_v62 = vsub.f32 %v2814_v34, %v925_v21  ;;  %978 = vadd.xlane.f32.xlu0 %v956_v11  ;;  %v140_v21 = vld [vmem:[#allocation5 + $0xb8] sm:$0xff]  ;;  %1984 = vmatprep.subr.bf16.mxu1 %v1983_v1 }
 0x409   :  { %v902_v60 = vpop.xlane.xlu0 %901  ;;  %1986 = vmatpush3.bf16.msra.mxu1 %v1983_v1  ;;  %v1991_v11 = vpack.c.bf16 %v140_v21, %v139_v52 }
 0x40a   :  { %v926_v58 = vmul.f32 0.0078125, %v902_v60  ;;  %v957_v37 = vmul.f32 %v2885_v62, %v2885_v62  ;;  %v144_v60 = vld [vmem:[#allocation5 + $0x138] sm:$0xff] }
 0x40c   :  { %v2890_v35 = vsub.f32 %v2818_v19, %v926_v58  ;;  %980 = vadd.xlane.f32.xlu1 %v957_v37  ;;  %v1999_v58 = vpack.c.bf16 %v144_v60, %v143_v15  ;;  %v145_v37 = vld [vmem:[#allocation5 + $0x158] sm:$0xff] }
 0x40d   :  { %v904_v29 = vpop.xlane.xlu1 %903  ;;  %v2003_v23 = vpack.c.bf16 %v146_v13, %v145_v37 }
 0x40e   :  { %v927_v9 = vmul.f32 0.0078125, %v904_v29  ;;  %v958_v34 = vmul.f32 %v2890_v35, %v2890_v35  ;;  %v148_v29 = vld [vmem:[#allocation5 + $0x1b8] sm:$0xff] }
 0x410   :  { %v2895_v20 = vsub.f32 %v2822_v18, %v927_v9  ;;  %982 = vadd.xlane.f32.xlu0 %v958_v34  ;;  %v2007_v9 = vpack.c.bf16 %v148_v29, %v147_v24 }
 0x411   :  { %v906_v32 = vpop.xlane.xlu0 %905 }
 0x412   :  { %v928_v25 = vmul.f32 0.0078125, %v906_v32  ;;  %v959_v19 = vmul.f32 %v2895_v20, %v2895_v20 }
 0x414   :  { %v2900_v56 = vsub.f32 %v2826_v46, %v928_v25  ;;  %984 = vadd.xlane.f32.xlu1 %v959_v19 }
 0x415   :  { %v908_v6 = vpop.xlane.xlu1 %907 }
 0x416   :  { %v929_v44 = vmul.f32 0.0078125, %v908_v6  ;;  %v960_v18 = vmul.f32 %v2900_v56, %v2900_v56 }
 0x418   :  { %v2905_v45 = vsub.f32 %v2830_v5, %v929_v44  ;;  %986 = vadd.xlane.f32.xlu0 %v960_v18 }
 0x419   :  { %v910_v50 = vpop.xlane.xlu0 %909 }
 0x41a   :  { %v930_v27 = vmul.f32 0.0078125, %v910_v50  ;;  %v961_v59 = vmul.f32 %v2905_v45, %v2905_v45  ;;  %v2929_v50 = vld [vmem:[#allocation8 + $0x4] ss:$0 sm:$0xff] }
 0x41c   :  { %v2910_v46 = vsub.f32 %v2834_v39, %v930_v27  ;;  %988 = vadd.xlane.f32.xlu1 %v961_v59 }
 0x41d   :  { %v912_v7 = vpop.xlane.xlu1 %911 }
 0x41e   :  { %v931_v61 = vmul.f32 0.0078125, %v912_v7  ;;  %v962_v8 = vmul.f32 %v2910_v46, %v2910_v46 }
 0x420   :  { %v2915_v3 = vsub.f32 %v2838_v31, %v931_v61  ;;  %990 = vadd.xlane.f32.xlu0 %v962_v8  ;;  %v2932_v61 = vld [vmem:[#allocation8 + $0x5] ss:$0 sm:$0xff] }
 0x421   :  { %v914_v5 = vpop.xlane.xlu0 %913 }
 0x422   :  { %v932_v38 = vmul.f32 0.0078125, %v914_v5  ;;  %v963_v40 = vmul.f32 %v2915_v3, %v2915_v3 }
 0x424   :  { %v2920_v16 = vsub.f32 %v2842_v51, %v932_v38  ;;  %992 = vadd.xlane.f32.xlu1 %v963_v40  ;;  %v138_v51 = vld [vmem:[#allocation5 + $0x78] sm:$0xff] }
 0x425   :  { %v916_v39 = vpop.xlane.xlu1 %915  ;;  %v1987_v30 = vpack.c.bf16 %v138_v51, %v137_v42 }
 0x426   :  { %v933_v48 = vmul.f32 0.0078125, %v916_v39  ;;  %v964_v22 = vmul.f32 %v2920_v16, %v2920_v16 }
 0x427   :  { %1988 = vmatprep.subr.bf16.mxu1 %v1987_v30 }
 0x428   :  { %v2925_v55 = vsub.f32 %v2846_v33, %v933_v48  ;;  %994 = vadd.xlane.f32.xlu0 %v964_v22  ;;  %v142_v33 = vld [vmem:[#allocation5 + $0xf8] sm:$0xff]  ;;  %1990 = vmatpush3.bf16.msra.mxu1 %v1987_v30 }
 0x429   :  { %1992 = vmatprep.subr.bf16.mxu1 %v1991_v11  ;;  %v1995_v26 = vpack.c.bf16 %v142_v33, %v141_v12 }
 0x42a   :  { %v965_v31 = vmul.f32 %v2925_v55, %v2925_v55 }
 0x42c   :  { %996 = vadd.xlane.f32.xlu1 %v965_v31  ;;  %1994 = vmatpush3.bf16.msra.mxu1 %v1991_v11 }
 0x42d   :  { %1996 = vmatprep.subr.bf16.mxu1 %v1995_v26 }
 0x430   :  { %1998 = vmatpush3.bf16.msra.mxu1 %v1995_v26 }
 0x431   :  { %2000 = vmatprep.subr.bf16.mxu1 %v1999_v58 }
 0x434   :  { %2002 = vmatpush3.bf16.msra.mxu1 %v1999_v58 }
 0x435   :  { %2004 = vmatprep.subr.bf16.mxu1 %v2003_v23 }
 0x438   :  { %2006 = vmatpush3.bf16.msra.mxu1 %v2003_v23 }
 0x439   :  { %2008 = vmatprep.subr.bf16.mxu1 %v2007_v9 }
 0x43c   :  { %2010 = vmatpush3.bf16.msra.mxu1 %v2007_v9 }
 0x47d   :  { %v967_v34 = vpop.xlane.xlu0 %966 }
 0x47e   :  { %v998_v54 = vmul.f32 0.0078125, %v967_v34 }
 0x480   :  { %v1014_v49 = vadd.f32 1e-05, %v998_v54 }
 0x481   :  { %v969_v28 = vpop.xlane.xlu1 %968 }
 0x482   :  { %2057 = vrsqrt.f32 %v1014_v49  ;;  %v999_v32 = vmul.f32 0.0078125, %v969_v28 }
 0x484   :  { %v1015_v25 = vadd.f32 1e-05, %v999_v32 }
 0x485   :  { %v971_v19 = vpop.xlane.xlu0 %970 }
 0x486   :  { %2059 = vrsqrt.f32 %v1015_v25  ;;  %v1000_v10 = vmul.f32 0.0078125, %v971_v19 }
 0x488   :  { %v1016_v17 = vadd.f32 1e-05, %v1000_v10 }
 0x489   :  { %v973_v0 = vpop.xlane.xlu1 %972 }
 0x48a   :  { %2061 = vrsqrt.f32 %v1016_v17  ;;  %v1001_v6 = vmul.f32 0.0078125, %v973_v0 }
 0x48c   :  { %v2058_v44 = vpop.eup %2057  ;;  %v1017_v18 = vadd.f32 1e-05, %v1001_v6 }
 0x48d   :  { %v975_v27 = vpop.xlane.xlu0 %974  ;;  %v1046_v59 = vmul.f32 %v2058_v44, %v2850_v43 }
 0x48e   :  { %2063 = vrsqrt.f32 %v1017_v18  ;;  %v1002_v7 = vmul.f32 0.0078125, %v975_v27 }
 0x48f   :  { %v1062_v8 = vmul.f32 %v1046_v59, %v2929_v50 }
 0x490   :  { %v2060_v5 = vpop.eup %2059  ;;  %v1018_v38 = vadd.f32 1e-05, %v1002_v7 }
 0x491   :  { %v1047_v40 = vmul.f32 %v2060_v5, %v2855_v4  ;;  %v977_v39 = vpop.xlane.xlu1 %976  ;;  %v1078_v48 = vadd.f32 %v1062_v8, %v2932_v61 }
 0x492   :  { %2065 = vrsqrt.f32 %v1018_v38  ;;  %v1003_v22 = vmul.f32 0.0078125, %v977_v39 }
 0x493   :  { %v1094_v31 = vmax.f32 %v1078_v48, 0.0  ;;  %v1063_v53 = vmul.f32 %v1047_v40, %v2929_v50 }
 0x494   :  { %v2062_v47 = vpop.eup %2061  ;;  %v1019_v43 = vadd.f32 1e-05, %v1003_v22 }
 0x495   :  { %1807 = vmatprep.mubr.f32.mxu0 %v1094_v31  ;;  %v979_v42 = vpop.xlane.xlu0 %978  ;;  %v1079_v1 = vadd.f32 %v1063_v53, %v2932_v61  ;;  %v1048_v51 = vmul.f32 %v2062_v47, %v2860_v63 }
 0x496   :  { %2067 = vrsqrt.f32 %v1019_v43  ;;  %v1004_v30 = vmul.f32 0.0078125, %v979_v42 }
 0x497   :  { %v1095_v52 = vmax.f32 %v1079_v1, 0.0  ;;  %v1064_v4 = vmul.f32 %v1048_v51, %v2929_v50 }
 0x498   :  { %v2064_v21 = vpop.eup %2063  ;;  %v1020_v11 = vadd.f32 1e-05, %v1004_v30 }
 0x499   :  { %v981_v12 = vpop.xlane.xlu1 %980  ;;  %1808 = vmatmul.mubr.f32.vlgmr.msra.gmra.mrb[32].mxu0 %v1095_v52  ;;  %v1080_v33 = vadd.f32 %v1064_v4, %v2932_v61  ;;  %v1049_v26 = vmul.f32 %v2064_v21, %v2865_v14 }
 0x49a   :  { %2069 = vrsqrt.f32 %v1020_v11  ;;  %v1005_v15 = vmul.f32 0.0078125, %v981_v12 }
 0x49b   :  { %v1096_v60 = vmax.f32 %v1080_v33, 0.0  ;;  %v1065_v58 = vmul.f32 %v1049_v26, %v2929_v50 }
 0x49c   :  { %v2066_v37 = vpop.eup %2065  ;;  %v1021_v63 = vadd.f32 1e-05, %v1005_v15 }
 0x49d   :  { %1810 = vmatprep.mubr.f32.mxu0 %v1096_v60  ;;  %v983_v13 = vpop.xlane.xlu0 %982  ;;  %v1081_v23 = vadd.f32 %v1065_v58, %v2932_v61  ;;  %v1050_v24 = vmul.f32 %v2066_v37, %v2870_v41 }
 0x49e   :  { %2071 = vrsqrt.f32 %v1021_v63  ;;  %v1006_v29 = vmul.f32 0.0078125, %v983_v13 }
 0x49f   :  { %v1097_v9 = vmax.f32 %v1081_v23, 0.0  ;;  %v1066_v34 = vmul.f32 %v1050_v24, %v2929_v50 }
 0x4a0   :  { %v2068_v54 = vpop.eup %2067  ;;  %v1022_v14 = vadd.f32 1e-05, %v1006_v29 }
 0x4a1   :  { %v985_v49 = vpop.xlane.xlu1 %984  ;;  %1811 = vmatmul.mubr.f32.gmra.mrb[34].mxu0 %v1097_v9  ;;  %v1082_v28 = vadd.f32 %v1066_v34, %v2932_v61  ;;  %v1051_v32 = vmul.f32 %v2068_v54, %v2875_v36 }
 0x4a2   :  { %2073 = vrsqrt.f32 %v1022_v14  ;;  %v1007_v25 = vmul.f32 0.0078125, %v985_v49 }
 0x4a3   :  { %v1098_v19 = vmax.f32 %v1082_v28, 0.0  ;;  %v1067_v10 = vmul.f32 %v1051_v32, %v2929_v50 }
 0x4a4   :  { %v2070_v17 = vpop.eup %2069  ;;  %v1023_v41 = vadd.f32 1e-05, %v1007_v25 }
 0x4a5   :  { %1813 = vmatprep.mubr.f32.mxu0 %v1098_v19  ;;  %v987_v0 = vpop.xlane.xlu0 %986  ;;  %v1083_v6 = vadd.f32 %v1067_v10, %v2932_v61  ;;  %v1052_v44 = vmul.f32 %v2070_v17, %v2880_v57 }
 0x4a6   :  { %2075 = vrsqrt.f32 %v1023_v41  ;;  %v1008_v18 = vmul.f32 0.0078125, %v987_v0 }
 0x4a7   :  { %v1099_v27 = vmax.f32 %v1083_v6, 0.0  ;;  %v1068_v59 = vmul.f32 %v1052_v44, %v2929_v50 }
 0x4a8   :  { %v2072_v7 = vpop.eup %2071  ;;  %v1024_v36 = vadd.f32 1e-05, %v1008_v18 }
 0x4a9   :  { %v989_v8 = vpop.xlane.xlu1 %988  ;;  %1814 = vmatmul.mubr.f32.gmra.mrb[36].mxu0 %v1099_v27  ;;  %v1084_v5 = vadd.f32 %v1068_v59, %v2932_v61  ;;  %v1053_v38 = vmul.f32 %v2072_v7, %v2885_v62 }
 0x4aa   :  { %2077 = vrsqrt.f32 %v1024_v36  ;;  %v1009_v40 = vmul.f32 0.0078125, %v989_v8 }
 0x4ab   :  { %v1100_v39 = vmax.f32 %v1084_v5, 0.0  ;;  %v1069_v48 = vmul.f32 %v1053_v38, %v2929_v50  ;;  %v149_v38 = vld [vmem:[#allocation5 + $0x1d8] sm:$0xff] }
 0x4ac   :  { %v2074_v22 = vpop.eup %2073  ;;  %v1025_v57 = vadd.f32 1e-05, %v1009_v40  ;;  %v150_v40 = vld [vmem:[#allocation5 + $0x1f8] sm:$0xff] }
 0x4ad   :  { %1816 = vmatprep.mubr.f32.mxu0 %v1100_v39  ;;  %v991_v31 = vpop.xlane.xlu0 %990  ;;  %v1085_v53 = vadd.f32 %v1069_v48, %v2932_v61  ;;  %v1054_v47 = vmul.f32 %v2074_v22, %v2890_v35  ;;  %v159_v39 = vld [vmem:[#allocation8 + $0x6] ss:$0 sm:$0xff] }
 0x4ae   :  { %2079 = vrsqrt.f32 %v1025_v57  ;;  %v1010_v43 = vmul.f32 0.0078125, %v991_v31 }
 0x4af   :  { %v1101_v42 = vmax.f32 %v1085_v53, 0.0  ;;  %v1070_v1 = vmul.f32 %v1054_v47, %v2929_v50 }
 0x4b0   :  { %v2076_v51 = vpop.eup %2075  ;;  %v1026_v62 = vadd.f32 1e-05, %v1010_v43 }
 0x4b1   :  { %v993_v30 = vpop.xlane.xlu1 %992  ;;  %1817 = vmatmul.mubr.f32.gmra.mrb[38].mxu0 %v1101_v42  ;;  %v1086_v52 = vadd.f32 %v1070_v1, %v2932_v61  ;;  %v1055_v4 = vmul.f32 %v2076_v51, %v2895_v20 }
 0x4b2   :  { %2081 = vrsqrt.f32 %v1026_v62  ;;  %v1011_v21 = vmul.f32 0.0078125, %v993_v30 }
 0x4b3   :  { %v1102_v11 = vmax.f32 %v1086_v52, 0.0  ;;  %v1071_v12 = vmul.f32 %v1055_v4, %v2929_v50 }
 0x4b4   :  { %v2078_v33 = vpop.eup %2077  ;;  %v1027_v35 = vadd.f32 1e-05, %v1011_v21 }
 0x4b5   :  { %1819 = vmatprep.mubr.f32.mxu0 %v1102_v11  ;;  %v995_v26 = vpop.xlane.xlu0 %994  ;;  %v1087_v15 = vadd.f32 %v1071_v12, %v2932_v61  ;;  %v1056_v60 = vmul.f32 %v2078_v33, %v2900_v56 }
 0x4b6   :  { %2083 = vrsqrt.f32 %v1027_v35  ;;  %v1012_v58 = vmul.f32 0.0078125, %v995_v26 }
 0x4b7   :  { %v1103_v37 = vmax.f32 %v1087_v15, 0.0  ;;  %v1072_v63 = vmul.f32 %v1056_v60, %v2929_v50 }
 0x4b8   :  { %v2080_v13 = vpop.eup %2079  ;;  %v1028_v20 = vadd.f32 1e-05, %v1012_v58 }
 0x4b9   :  { %v997_v23 = vpop.xlane.xlu1 %996  ;;  %1820 = vmatmul.mubr.f32.gmra.mrb[40].mxu0 %v1103_v37  ;;  %v1088_v24 = vadd.f32 %v1072_v63, %v2932_v61  ;;  %v1057_v29 = vmul.f32 %v2080_v13, %v2905_v45 }
 0x4ba   :  { %2085 = vrsqrt.f32 %v1028_v20  ;;  %v1013_v9 = vmul.f32 0.0078125, %v997_v23 }
 0x4bb   :  { %v1104_v34 = vmax.f32 %v1088_v24, 0.0  ;;  %v1073_v54 = vmul.f32 %v1057_v29, %v2929_v50 }
 0x4bc   :  { %v2082_v14 = vpop.eup %2081  ;;  %v1029_v56 = vadd.f32 1e-05, %v1013_v9 }
 0x4bd   :  { %1822 = vmatprep.mubr.f32.mxu0 %v1104_v34  ;;  %v1089_v49 = vadd.f32 %v1073_v54, %v2932_v61  ;;  %v1058_v28 = vmul.f32 %v2082_v14, %v2910_v46 }
 0x4be   :  { %2087 = vrsqrt.f32 %v1029_v56 }
 0x4bf   :  { %v1105_v32 = vmax.f32 %v1089_v49, 0.0  ;;  %v1074_v25 = vmul.f32 %v1058_v28, %v2929_v50 }
 0x4c0   :  { %v2084_v19 = vpop.eup %2083 }
 0x4c1   :  { %1823 = vmatmul.mubr.f32.gmra.mrb[42].mxu0 %v1105_v32  ;;  %v1090_v45 = vadd.f32 %v1074_v25, %v2932_v61  ;;  %v1059_v10 = vmul.f32 %v2084_v19, %v2915_v3 }
 0x4c3   :  { %v1106_v17 = vmax.f32 %v1090_v45, 0.0  ;;  %v1075_v41 = vmul.f32 %v1059_v10, %v2929_v50 }
 0x4c4   :  { %v2086_v0 = vpop.eup %2085 }
 0x4c5   :  { %1825 = vmatprep.mubr.f32.mxu0 %v1106_v17  ;;  %v1091_v6 = vadd.f32 %v1075_v41, %v2932_v61  ;;  %v1060_v44 = vmul.f32 %v2086_v0, %v2920_v16  ;;  %v2011_v16 = vpack.c.bf16 %v150_v40, %v149_v38 }
 0x4c7   :  { %v1107_v46 = vmax.f32 %v1091_v6, 0.0  ;;  %v1076_v18 = vmul.f32 %v1060_v44, %v2929_v50  ;;  %2012 = vmatprep.subr.bf16.mxu1 %v2011_v16  ;;  %v2982_v6 = vand.u32 127, %v162_v2  ;;  %v160_v44 = vld [vmem:[#allocation8 + $0x7] ss:$0 sm:$0xff] }
 0x4c8   :  { %v2088_v27 = vpop.eup %2087  ;;  %2014 = vmatpush3.bf16.msra.mxu1 %v2011_v16 }
 0x4c9   :  { %1826 = vmatmul.mubr.f32.gmra.mrb[44].mxu0 %v1107_v46  ;;  %v1092_v59 = vadd.f32 %v1076_v18, %v2932_v61  ;;  %v1061_v7 = vmul.f32 %v2088_v27, %v2925_v55  ;;  %vm1418_vm0 = vcmp.lt.s32.totalorder %v2982_v6, 8  ;;  %vm1579_vm1 = vcmp.eq.s32.totalorder %v2982_v6, 8 }
 0x4cb   :  { %v1108_v36 = vmax.f32 %v1092_v59, 0.0  ;;  %v1077_v3 = vmul.f32 %v1061_v7, %v2929_v50 }
 0x4cd   :  { %1828 = vmatprep.mubr.f32.mxu0 %v1108_v36  ;;  %v1093_v8 = vadd.f32 %v1077_v3, %v2932_v61 }
 0x4cf   :  { %v1109_v5 = vmax.f32 %v1093_v8, 0.0 }
 0x4d1   :  { %1829 = vmatmul.mubr.f32.gmra.mrb[46].mxu0 %v1109_v5 }
 0x56c   :  { %v1809_v48 = vpop.f32.mrb[32].mxu0 }
 0x56d   :  { %v1182_v22 = vadd.f32 %v1809_v48, %v159_v39  ;;  %v1176_v57 = vpop.f32.mrb[33].mxu0 }
 0x56e   :  { %v1177_v31 = vadd.f32 %v1176_v57, %v159_v39 }
 0x56f   :  { %v1256_v55 = vmax.f32 %v1182_v22, 0.0 }
 0x570   :  { %v1255_v53 = vmax.f32 %v1177_v31, 0.0 }
 0x572   :  { %1863 = vmatprep.mubr.f32.mxu1 %v1255_v53 }
 0x573   :  { %1864 = vmatmul.mubr.f32.vlgmr.msra.gmra.mrb[32].mxu1 %v1256_v55 }
 0x574   :  { %v1812_v50 = vpop.f32.mrb[34].mxu0 }
 0x575   :  { %v1192_v47 = vadd.f32 %v1812_v50, %v159_v39  ;;  %v1186_v43 = vpop.f32.mrb[35].mxu0 }
 0x576   :  { %v1187_v61 = vadd.f32 %v1186_v43, %v159_v39 }
 0x577   :  { %v1258_v1 = vmax.f32 %v1192_v47, 0.0 }
 0x578   :  { %v1257_v42 = vmax.f32 %v1187_v61, 0.0 }
 0x57a   :  { %1866 = vmatprep.mubr.f32.mxu1 %v1257_v42 }
 0x57b   :  { %1867 = vmatmul.mubr.f32.gmra.mrb[34].mxu1 %v1258_v1 }
 0x57c   :  { %v1815_v51 = vpop.f32.mrb[36].mxu0 }
 0x57d   :  { %v1202_v62 = vadd.f32 %v1815_v51, %v159_v39  ;;  %v1196_v30 = vpop.f32.mrb[37].mxu0 }
 0x57e   :  { %v1197_v52 = vadd.f32 %v1196_v30, %v159_v39 }
 0x57f   :  { %v1260_v21 = vmax.f32 %v1202_v62, 0.0 }
 0x580   :  { %v1259_v4 = vmax.f32 %v1197_v52, 0.0 }
 0x582   :  { %1869 = vmatprep.mubr.f32.mxu1 %v1259_v4 }
 0x583   :  { %1870 = vmatmul.mubr.f32.gmra.mrb[36].mxu1 %v1260_v21 }
 0x584   :  { %v1818_v11 = vpop.f32.mrb[38].mxu0 }
 0x585   :  { %v1212_v12 = vadd.f32 %v1818_v11, %v159_v39  ;;  %v1206_v33 = vpop.f32.mrb[39].mxu0 }
 0x586   :  { %v1207_v35 = vadd.f32 %v1206_v33, %v159_v39 }
 0x587   :  { %v1262_v15 = vmax.f32 %v1212_v12, 0.0 }
 0x588   :  { %v1261_v26 = vmax.f32 %v1207_v35, 0.0 }
 0x58a   :  { %1872 = vmatprep.mubr.f32.mxu1 %v1261_v26 }
 0x58b   :  { %1873 = vmatmul.mubr.f32.gmra.mrb[38].mxu1 %v1262_v15 }
 0x58c   :  { %v1821_v60 = vpop.f32.mrb[40].mxu0 }
 0x58d   :  { %v1222_v58 = vadd.f32 %v1821_v60, %v159_v39  ;;  %v1216_v37 = vpop.f32.mrb[41].mxu0 }
 0x58e   :  { %v1217_v63 = vadd.f32 %v1216_v37, %v159_v39 }
 0x58f   :  { %v1264_v20 = vmax.f32 %v1222_v58, 0.0 }
 0x590   :  { %v1263_v13 = vmax.f32 %v1217_v63, 0.0 }
 0x592   :  { %1875 = vmatprep.mubr.f32.mxu1 %v1263_v13 }
 0x593   :  { %1876 = vmatmul.mubr.f32.gmra.mrb[40].mxu1 %v1264_v20 }
 0x594   :  { %v1824_v23 = vpop.f32.mrb[42].mxu0 }
 0x595   :  { %v1232_v24 = vadd.f32 %v1824_v23, %v159_v39  ;;  %v1226_v29 = vpop.f32.mrb[43].mxu0 }
 0x596   :  { %v1227_v9 = vadd.f32 %v1226_v29, %v159_v39 }
 0x597   :  { %v1266_v54 = vmax.f32 %v1232_v24, 0.0 }
 0x598   :  { %v1265_v34 = vmax.f32 %v1227_v9, 0.0 }
 0x59a   :  { %1878 = vmatprep.mubr.f32.mxu1 %v1265_v34 }
 0x59b   :  { %1879 = vmatmul.mubr.f32.gmra.mrb[42].mxu1 %v1266_v54 }
 0x59c   :  { %v1827_v14 = vpop.f32.mrb[44].mxu0 }
 0x59d   :  { %v1242_v56 = vadd.f32 %v1827_v14, %v159_v39  ;;  %v1236_v49 = vpop.f32.mrb[45].mxu0 }
 0x59e   :  { %v1237_v28 = vadd.f32 %v1236_v49, %v159_v39 }
 0x59f   :  { %v1268_v25 = vmax.f32 %v1242_v56, 0.0 }
 0x5a0   :  { %v1267_v32 = vmax.f32 %v1237_v28, 0.0 }
 0x5a2   :  { %1881 = vmatprep.mubr.f32.mxu1 %v1267_v32 }
 0x5a3   :  { %1882 = vmatmul.mubr.f32.gmra.mrb[44].mxu1 %v1268_v25 }
 0x5a4   :  { %v1830_v19 = vpop.f32.mrb[46].mxu0 }
 0x5a5   :  { %v1252_v45 = vadd.f32 %v1830_v19, %v159_v39  ;;  %v1246_v10 = vpop.f32.mrb[47].mxu0 }
 0x5a6   :  { %v1247_v17 = vadd.f32 %v1246_v10, %v159_v39 }
 0x5a7   :  { %v1270_v0 = vmax.f32 %v1252_v45, 0.0 }
 0x5a8   :  { %v1269_v41 = vmax.f32 %v1247_v17, 0.0 }
 0x5aa   :  { %1884 = vmatprep.mubr.f32.mxu1 %v1269_v41 }
 0x5ab   :  { %1885 = vmatmul.mubr.f32.gmra.mrb[46].mxu1 %v1270_v0 }
 0x646   :  { %v1865_v46 = vpop.f32.mrb[32].mxu1 }
 0x647   :  { %v2985_v18 = vadd.f32 %v1865_v46, %v160_v44  ;;  %v1337_v27 = vpop.f32.mrb[33].mxu1 }
 0x648   :  { %v2987_v59 = vadd.f32 %v1337_v27, %v160_v44 }
 0x649   :  { %v2992_v7 = vsel %vm1418_vm0, %v2985_v18, -inf }
 0x64a   :  { %1437 = vmax.xlane.f32.xlu1 %v2992_v7  ;;  %v2998_v2 = vsel %vm1418_vm0, %v2987_v59, -inf }
 0x64b   :  { %1435 = vmax.xlane.f32.xlu0 %v2998_v2 }
 0x64e   :  { %v1868_v36 = vpop.f32.mrb[34].mxu1 }
 0x64f   :  { %v3001_v3 = vadd.f32 %v1868_v36, %v160_v44  ;;  %v1347_v8 = vpop.f32.mrb[35].mxu1 }
 0x650   :  { %v3003_v5 = vadd.f32 %v1347_v8, %v160_v44 }
 0x651   :  { %v3008_v38 = vsel %vm1418_vm0, %v3001_v3, -inf }
 0x652   :  { %1441 = vmax.xlane.f32.xlu1 %v3008_v38  ;;  %v3014_v40 = vsel %vm1418_vm0, %v3003_v5, -inf }
 0x653   :  { %1439 = vmax.xlane.f32.xlu0 %v3014_v40 }
 0x656   :  { %v1871_v16 = vpop.f32.mrb[36].mxu1 }
 0x657   :  { %v3017_v39 = vadd.f32 %v1871_v16, %v160_v44  ;;  %v1357_v48 = vpop.f32.mrb[37].mxu1 }
 0x658   :  { %v3019_v22 = vadd.f32 %v1357_v48, %v160_v44 }
 0x659   :  { %v3024_v57 = vsel %vm1418_vm0, %v3017_v39, -inf }
 0x65a   :  { %1445 = vmax.xlane.f32.xlu1 %v3024_v57  ;;  %v3030_v31 = vsel %vm1418_vm0, %v3019_v22, -inf }
 0x65b   :  { %1443 = vmax.xlane.f32.xlu0 %v3030_v31 }
 0x65e   :  { %v1874_v53 = vpop.f32.mrb[38].mxu1 }
 0x65f   :  { %v3033_v55 = vadd.f32 %v1874_v53, %v160_v44  ;;  %v1367_v50 = vpop.f32.mrb[39].mxu1 }
 0x660   :  { %v3035_v47 = vadd.f32 %v1367_v50, %v160_v44 }
 0x661   :  { %v3040_v43 = vsel %vm1418_vm0, %v3033_v55, -inf }
 0x662   :  { %1449 = vmax.xlane.f32.xlu1 %v3040_v43  ;;  %v3046_v61 = vsel %vm1418_vm0, %v3035_v47, -inf }
 0x663   :  { %1447 = vmax.xlane.f32.xlu0 %v3046_v61 }
 0x666   :  { %v1877_v42 = vpop.f32.mrb[40].mxu1 }
 0x667   :  { %v3049_v1 = vadd.f32 %v1877_v42, %v160_v44  ;;  %v1377_v51 = vpop.f32.mrb[41].mxu1 }
 0x668   :  { %v3051_v62 = vadd.f32 %v1377_v51, %v160_v44 }
 0x669   :  { %v3056_v30 = vsel %vm1418_vm0, %v3049_v1, -inf }
 0x66a   :  { %1453 = vmax.xlane.f32.xlu1 %v3056_v30  ;;  %v3062_v52 = vsel %vm1418_vm0, %v3051_v62, -inf }
 0x66b   :  { %1451 = vmax.xlane.f32.xlu0 %v3062_v52 }
 0x66e   :  { %v1880_v4 = vpop.f32.mrb[42].mxu1 }
 0x66f   :  { %v3065_v21 = vadd.f32 %v1880_v4, %v160_v44  ;;  %v1387_v11 = vpop.f32.mrb[43].mxu1 }
 0x670   :  { %v3067_v12 = vadd.f32 %v1387_v11, %v160_v44 }
 0x671   :  { %v3072_v33 = vsel %vm1418_vm0, %v3065_v21, -inf }
 0x672   :  { %1457 = vmax.xlane.f32.xlu1 %v3072_v33  ;;  %v3078_v35 = vsel %vm1418_vm0, %v3067_v12, -inf }
 0x673   :  { %1455 = vmax.xlane.f32.xlu0 %v3078_v35 }
 0x676   :  { %v1883_v26 = vpop.f32.mrb[44].mxu1 }
 0x677   :  { %v3081_v15 = vadd.f32 %v1883_v26, %v160_v44  ;;  %v1397_v60 = vpop.f32.mrb[45].mxu1 }
 0x678   :  { %v3083_v58 = vadd.f32 %v1397_v60, %v160_v44 }
 0x679   :  { %v3088_v37 = vsel %vm1418_vm0, %v3081_v15, -inf }
 0x67a   :  { %1461 = vmax.xlane.f32.xlu1 %v3088_v37  ;;  %v3094_v63 = vsel %vm1418_vm0, %v3083_v58, -inf }
 0x67b   :  { %1459 = vmax.xlane.f32.xlu0 %v3094_v63 }
 0x67e   :  { %v1886_v13 = vpop.f32.mrb[46].mxu1 }
 0x67f   :  { %v3097_v20 = vadd.f32 %v1886_v13, %v160_v44  ;;  %v1407_v23 = vpop.f32.mrb[47].mxu1 }
 0x680   :  { %v3099_v24 = vadd.f32 %v1407_v23, %v160_v44 }
 0x681   :  { %v3104_v29 = vsel %vm1418_vm0, %v3097_v20, -inf }
 0x682   :  { %1465 = vmax.xlane.f32.xlu1 %v3104_v29  ;;  %v3110_v9 = vsel %vm1418_vm0, %v3099_v24, -inf }
 0x683   :  { %1463 = vmax.xlane.f32.xlu0 %v3110_v9 }
 0x6d7   :  { %v1438_v34 = vpop.xlane.xlu1 %1437 }
 0x6d8   :  { %v1468_v54 = vsub.f32 %v2992_v7, %v1438_v34  ;;  %v1436_v14 = vpop.xlane.xlu0 %1435 }
 0x6d9   :  { %v1467_v56 = vsub.f32 %v2998_v2, %v1436_v14 }
 0x6da   :  { %v1485_v49 = vmul.f32 1.442695, %v1468_v54 }
 0x6db   :  { %v1483_v28 = vmul.f32 1.442695, %v1467_v56 }
 0x6dc   :  { %2089 = vpow2.f32 %v1485_v49 }
 0x6dd   :  { %2091 = vpow2.f32 %v1483_v28 }
 0x6df   :  { %v1442_v32 = vpop.xlane.xlu1 %1441 }
 0x6e0   :  { %v1470_v25 = vsub.f32 %v3008_v38, %v1442_v32  ;;  %v1440_v19 = vpop.xlane.xlu0 %1439 }
 0x6e1   :  { %v1469_v45 = vsub.f32 %v3014_v40, %v1440_v19 }
 0x6e2   :  { %v1489_v10 = vmul.f32 1.442695, %v1470_v25 }
 0x6e3   :  { %v1487_v17 = vmul.f32 1.442695, %v1469_v45 }
 0x6e4   :  { %2093 = vpow2.f32 %v1489_v10 }
 0x6e5   :  { %2095 = vpow2.f32 %v1487_v17 }
 0x6e6   :  { %v3117_v41 = vpop.eup %2089 }
 0x6e7   :  { %v3119_v0 = vpop.eup %2091  ;;  %v1446_v44 = vpop.xlane.xlu1 %1445  ;;  %1517 = vadd.xlane.f32.xlu1 %v3117_v41 }
 0x6e8   :  { %v1472_v46 = vsub.f32 %v3024_v57, %v1446_v44  ;;  %1515 = vadd.xlane.f32.xlu0 %v3119_v0  ;;  %v1444_v27 = vpop.xlane.xlu0 %1443 }
 0x6e9   :  { %v1471_v7 = vsub.f32 %v3030_v31, %v1444_v27 }
 0x6ea   :  { %v1493_v2 = vmul.f32 1.442695, %v1472_v46 }
 0x6eb   :  { %v1491_v36 = vmul.f32 1.442695, %v1471_v7 }
 0x6ec   :  { %2097 = vpow2.f32 %v1493_v2 }
 0x6ed   :  { %2099 = vpow2.f32 %v1491_v36 }
 0x6ee   :  { %v3125_v8 = vpop.eup %2093 }
 0x6ef   :  { %v3127_v38 = vpop.eup %2095  ;;  %v1450_v40 = vpop.xlane.xlu1 %1449  ;;  %1521 = vadd.xlane.f32.xlu1 %v3125_v8 }
 0x6f0   :  { %v1474_v16 = vsub.f32 %v3040_v43, %v1450_v40  ;;  %1519 = vadd.xlane.f32.xlu0 %v3127_v38  ;;  %v1448_v48 = vpop.xlane.xlu0 %1447 }
 0x6f1   :  { %v1473_v57 = vsub.f32 %v3046_v61, %v1448_v48 }
 0x6f2   :  { %v1497_v53 = vmul.f32 1.442695, %v1474_v16 }
 0x6f3   :  { %v1495_v31 = vmul.f32 1.442695, %v1473_v57 }
 0x6f4   :  { %2101 = vpow2.f32 %v1497_v53 }
 0x6f5   :  { %2103 = vpow2.f32 %v1495_v31 }
 0x6f6   :  { %v3133_v50 = vpop.eup %2097 }
 0x6f7   :  { %v3135_v42 = vpop.eup %2099  ;;  %v1454_v51 = vpop.xlane.xlu1 %1453  ;;  %1525 = vadd.xlane.f32.xlu1 %v3133_v50 }
 0x6f8   :  { %v1476_v4 = vsub.f32 %v3056_v30, %v1454_v51  ;;  %1523 = vadd.xlane.f32.xlu0 %v3135_v42  ;;  %v1452_v43 = vpop.xlane.xlu0 %1451 }
 0x6f9   :  { %v1475_v11 = vsub.f32 %v3062_v52, %v1452_v43 }
 0x6fa   :  { %v1501_v26 = vmul.f32 1.442695, %v1476_v4 }
 0x6fb   :  { %v1499_v61 = vmul.f32 1.442695, %v1475_v11 }
 0x6fc   :  { %2105 = vpow2.f32 %v1501_v26 }
 0x6fd   :  { %2107 = vpow2.f32 %v1499_v61 }
 0x6fe   :  { %v3141_v60 = vpop.eup %2101 }
 0x6ff   :  { %v3143_v13 = vpop.eup %2103  ;;  %v1458_v23 = vpop.xlane.xlu1 %1457  ;;  %1529 = vadd.xlane.f32.xlu1 %v3141_v60 }
 0x700   :  { %v1478_v34 = vsub.f32 %v3072_v33, %v1458_v23  ;;  %1527 = vadd.xlane.f32.xlu0 %v3143_v13  ;;  %v1456_v30 = vpop.xlane.xlu0 %1455 }
 0x701   :  { %v1477_v54 = vsub.f32 %v3078_v35, %v1456_v30 }
 0x702   :  { %v1505_v14 = vmul.f32 1.442695, %v1478_v34 }
 0x703   :  { %v1503_v52 = vmul.f32 1.442695, %v1477_v54 }
 0x704   :  { %2109 = vpow2.f32 %v1505_v14 }
 0x705   :  { %2111 = vpow2.f32 %v1503_v52 }
 0x706   :  { %v3149_v56 = vpop.eup %2105 }
 0x707   :  { %v3151_v49 = vpop.eup %2107  ;;  %v1462_v28 = vpop.xlane.xlu1 %1461  ;;  %1533 = vadd.xlane.f32.xlu1 %v3149_v56 }
 0x708   :  { %v1480_v32 = vsub.f32 %v3088_v37, %v1462_v28  ;;  %1531 = vadd.xlane.f32.xlu0 %v3151_v49  ;;  %v1460_v33 = vpop.xlane.xlu0 %1459 }
 0x709   :  { %v1479_v25 = vsub.f32 %v3094_v63, %v1460_v33 }
 0x70a   :  { %v1509_v19 = vmul.f32 1.442695, %v1480_v32 }
 0x70b   :  { %v1507_v35 = vmul.f32 1.442695, %v1479_v25 }
 0x70c   :  { %2113 = vpow2.f32 %v1509_v19 }
 0x70d   :  { %2115 = vpow2.f32 %v1507_v35 }
 0x70e   :  { %v3157_v45 = vpop.eup %2109 }
 0x70f   :  { %v3159_v10 = vpop.eup %2111  ;;  %1537 = vadd.xlane.f32.xlu1 %v3157_v45  ;;  %v1466_v17 = vpop.xlane.xlu1 %1465 }
 0x710   :  { %v1482_v44 = vsub.f32 %v3104_v29, %v1466_v17  ;;  %1535 = vadd.xlane.f32.xlu0 %v3159_v10  ;;  %v1464_v37 = vpop.xlane.xlu0 %1463 }
 0x711   :  { %v1481_v46 = vsub.f32 %v3110_v9, %v1464_v37 }
 0x712   :  { %v1513_v27 = vmul.f32 1.442695, %v1482_v44 }
 0x713   :  { %v1511_v63 = vmul.f32 1.442695, %v1481_v46 }
 0x714   :  { %2117 = vpow2.f32 %v1513_v27 }
 0x715   :  { %2119 = vpow2.f32 %v1511_v63 }
 0x716   :  { %v3165_v7 = vpop.eup %2113 }
 0x717   :  { %v3167_v2 = vpop.eup %2115  ;;  %1541 = vadd.xlane.f32.xlu1 %v3165_v7 }
 0x718   :  { %1539 = vadd.xlane.f32.xlu0 %v3167_v2 }
 0x71e   :  { %v3171_v36 = vpop.eup %2117 }
 0x71f   :  { %v3173_v29 = vpop.eup %2119  ;;  %1545 = vadd.xlane.f32.xlu1 %v3171_v36 }
 0x720   :  { %1543 = vadd.xlane.f32.xlu0 %v3173_v29 }
 0x774   :  { %v1518_v9 = vpop.xlane.xlu1 %1517 }
 0x775   :  { %2121 = vrcp.f32 %v1518_v9  ;;  %v1516_v40 = vpop.xlane.xlu0 %1515 }
 0x776   :  { %2123 = vrcp.f32 %v1516_v40 }
 0x77c   :  { %v1522_v16 = vpop.xlane.xlu1 %1521 }
 0x77d   :  { %2125 = vrcp.f32 %v1522_v16  ;;  %v1520_v48 = vpop.xlane.xlu0 %1519 }
 0x77e   :  { %2127 = vrcp.f32 %v1520_v48 }
 0x77f   :  { %v2122_v57 = vpop.eup %2121 }
 0x780   :  { %v2124_v53 = vpop.eup %2123  ;;  %v1564_v31 = vmul.f32 %v2122_v57, %v3117_v41 }
 0x781   :  { %v1563_v51 = vmul.f32 %v2124_v53, %v3119_v0 }
 0x782   :  { %v1581_v4 = vsel %vm1579_vm1, %v2985_v18, %v1564_v31 }
 0x783   :  { %1597 = vst [vmem:[#allocation10 + $0x8] sm:$0xff] %v1581_v4  ;;  %v1580_v43 = vsel %vm1579_vm1, %v2987_v59, %v1563_v51 }
 0x784   :  { %1596 = vst [vmem:[#allocation10] sm:$0xff] %v1580_v43  ;;  %v1526_v11 = vpop.xlane.xlu1 %1525 }
 0x785   :  { %2129 = vrcp.f32 %v1526_v11  ;;  %v1524_v26 = vpop.xlane.xlu0 %1523 }
 0x786   :  { %2131 = vrcp.f32 %v1524_v26 }
 0x787   :  { %v2126_v61 = vpop.eup %2125 }
 0x788   :  { %v2128_v23 = vpop.eup %2127  ;;  %v1566_v41 = vmul.f32 %v2126_v61, %v3125_v8 }
 0x789   :  { %v1565_v0 = vmul.f32 %v2128_v23, %v3127_v38 }
 0x78a   :  { %v1583_v18 = vsel %vm1579_vm1, %v3001_v3, %v1566_v41 }
 0x78b   :  { %1599 = vst [vmem:[#allocation10 + $0x18] sm:$0xff] %v1583_v18  ;;  %v1582_v59 = vsel %vm1579_vm1, %v3003_v5, %v1565_v0 }
 0x78c   :  { %1598 = vst [vmem:[#allocation10 + $0x10] sm:$0xff] %v1582_v59  ;;  %v1530_v34 = vpop.xlane.xlu1 %1529 }
 0x78d   :  { %2133 = vrcp.f32 %v1530_v34  ;;  %v1528_v30 = vpop.xlane.xlu0 %1527 }
 0x78e   :  { %2135 = vrcp.f32 %v1528_v30 }
 0x78f   :  { %v2130_v54 = vpop.eup %2129 }
 0x790   :  { %v2132_v14 = vpop.eup %2131  ;;  %v1568_v8 = vmul.f32 %v2130_v54, %v3133_v50 }
 0x791   :  { %v1567_v38 = vmul.f32 %v2132_v14, %v3135_v42 }
 0x792   :  { %v1585_v3 = vsel %vm1579_vm1, %v3017_v39, %v1568_v8 }
 0x793   :  { %1601 = vst [vmem:[#allocation10 + $0x28] sm:$0xff] %v1585_v3  ;;  %v1584_v5 = vsel %vm1579_vm1, %v3019_v22, %v1567_v38 }
 0x794   :  { %1600 = vst [vmem:[#allocation10 + $0x20] sm:$0xff] %v1584_v5  ;;  %v1534_v52 = vpop.xlane.xlu1 %1533 }
 0x795   :  { %2137 = vrcp.f32 %v1534_v52  ;;  %v1532_v28 = vpop.xlane.xlu0 %1531 }
 0x796   :  { %2139 = vrcp.f32 %v1532_v28 }
 0x797   :  { %v2134_v32 = vpop.eup %2133 }
 0x798   :  { %v2136_v33 = vpop.eup %2135  ;;  %v1570_v50 = vmul.f32 %v2134_v32, %v3141_v60 }
 0x799   :  { %v1569_v42 = vmul.f32 %v2136_v33, %v3143_v13 }
 0x79a   :  { %v1587_v39 = vsel %vm1579_vm1, %v3033_v55, %v1570_v50 }
 0x79b   :  { %1603 = vst [vmem:[#allocation10 + $0x38] sm:$0xff] %v1587_v39  ;;  %v1586_v22 = vsel %vm1579_vm1, %v3035_v47, %v1569_v42 }
 0x79c   :  { %1602 = vst [vmem:[#allocation10 + $0x30] sm:$0xff] %v1586_v22  ;;  %v1538_v25 = vpop.xlane.xlu1 %1537 }
 0x79d   :  { %2141 = vrcp.f32 %v1538_v25  ;;  %v1536_v19 = vpop.xlane.xlu0 %1535 }
 0x79e   :  { %2143 = vrcp.f32 %v1536_v19 }
 0x79f   :  { %v2138_v35 = vpop.eup %2137 }
 0x7a0   :  { %v2140_v17 = vpop.eup %2139  ;;  %v1572_v60 = vmul.f32 %v2138_v35, %v3149_v56 }
 0x7a1   :  { %v1571_v13 = vmul.f32 %v2140_v17, %v3151_v49 }
 0x7a2   :  { %v1589_v55 = vsel %vm1579_vm1, %v3049_v1, %v1572_v60 }
 0x7a3   :  { %1605 = vst [vmem:[#allocation10 + $0x48] sm:$0xff] %v1589_v55  ;;  %v1588_v47 = vsel %vm1579_vm1, %v3051_v62, %v1571_v13 }
 0x7a4   :  { %1604 = vst [vmem:[#allocation10 + $0x40] sm:$0xff] %v1588_v47  ;;  %v1542_v44 = vpop.xlane.xlu1 %1541 }
 0x7a5   :  { %2145 = vrcp.f32 %v1542_v44  ;;  %v1540_v37 = vpop.xlane.xlu0 %1539 }
 0x7a6   :  { %2147 = vrcp.f32 %v1540_v37 }
 0x7a7   :  { %v2142_v46 = vpop.eup %2141 }
 0x7a8   :  { %v2144_v27 = vpop.eup %2143  ;;  %v1574_v56 = vmul.f32 %v2142_v46, %v3157_v45 }
 0x7a9   :  { %v1573_v49 = vmul.f32 %v2144_v27, %v3159_v10 }
 0x7aa   :  { %v1591_v1 = vsel %vm1579_vm1, %v3065_v21, %v1574_v56 }
 0x7ab   :  { %1607 = vst [vmem:[#allocation10 + $0x58] sm:$0xff] %v1591_v1  ;;  %v1590_v62 = vsel %vm1579_vm1, %v3067_v12, %v1573_v49 }
 0x7ac   :  { %1606 = vst [vmem:[#allocation10 + $0x50] sm:$0xff] %v1590_v62  ;;  %v1546_v63 = vpop.xlane.xlu1 %1545 }
 0x7ad   :  { %2149 = vrcp.f32 %v1546_v63  ;;  %v1544_v9 = vpop.xlane.xlu0 %1543 }
 0x7ae   :  { %2151 = vrcp.f32 %v1544_v9 }
 0x7af   :  { %v2146_v40 = vpop.eup %2145 }
 0x7b0   :  { %v2148_v16 = vpop.eup %2147  ;;  %v1576_v45 = vmul.f32 %v2146_v40, %v3165_v7 }
 0x7b1   :  { %v1575_v10 = vmul.f32 %v2148_v16, %v3167_v2 }
 0x7b2   :  { %v1593_v21 = vsel %vm1579_vm1, %v3081_v15, %v1576_v45 }
 0x7b3   :  { %1609 = vst [vmem:[#allocation10 + $0x68] sm:$0xff] %v1593_v21  ;;  %v1592_v12 = vsel %vm1579_vm1, %v3083_v58, %v1575_v10 }
 0x7b4   :  { %1608 = vst [vmem:[#allocation10 + $0x60] sm:$0xff] %v1592_v12 }
 0x7b7   :  { %v2150_v48 = vpop.eup %2149 }
 0x7b8   :  { %v2152_v57 = vpop.eup %2151  ;;  %v1578_v53 = vmul.f32 %v2150_v48, %v3171_v36 }
 0x7b9   :  { %v1577_v7 = vmul.f32 %v2152_v57, %v3173_v29 }
 0x7ba   :  { %v1595_v2 = vsel %vm1579_vm1, %v3097_v20, %v1578_v53 }
 0x7bb   :  { %1611 = vst [vmem:[#allocation10 + $0x78] sm:$0xff] %v1595_v2  ;;  %v1594_v15 = vsel %vm1579_vm1, %v3099_v24, %v1577_v7 }
 0x7bc   :  { %1610 = vst [vmem:[#allocation10 + $0x70] sm:$0xff] %v1594_v15 }
 0x7bd   :  { %2252 = shalt.err (!%p2249_p8)
}
 0x7be   :  { %s2253_s17 = scalar_lea.hbm %s3261_s4, 2048 }
 0x7bf   :  { %p2254_p9 = scmp.ne.s32.totalorder %s3261_s4, %s2253_s17  ;;  %p2257_p10 = scmp.lt.u32.totalorder %s2253_s17, %s3261_s4 }
 0x7c1   :  { %p2259_p11 = pnand %p2257_p10, %p2254_p9 }
 0x7c3   :  { %2262 = shalt.err (!%p2259_p11)
}
 0x7c4   :  { %1623 = dma.vmem_to_hbm [thread:$0]  %s1618_s12, 2048, %s3261_s4, [#allocation4], %s2275_s1, %s2275_s1, %s2276_s13  }
 0x7c5   :  { %2269 = dma.done.wait [#allocation4], 2048  }
 0x7c6   :  { %2270 = vsyncadd [#allocation4], 4294965248 }
 0x7c7   :  { %1627 = vsyncpa [#allocation3], 1 }
 0x7c8   :  { %1628 = vsyncpa [#allocation6], 1 }
 0x7c9   :  { %1629 = vsyncpa [#allocation9], 1 }
 0x7ca   :  { %1630 = vsyncpa [#allocation4], 1 }

</bundles_post_ra>
